<compile_context>
chip_gen: v7x
topology: tpu7x:2x2x1
jax: 0.10.0
libtpu: 0.0.40
codegen_flags: <defaults>
</compile_context>

<pallas_src>
import functools

import jax
import jax.numpy as jnp
from jax import lax
from jax.experimental import pallas as pl
from jax.experimental.pallas import tpu as pltpu


def _round_up(x, m):
    return (x + m - 1) // m * m


def bow_nsp_kernel(ids_ref, emb_hbm, w1p_ref, w1h_ref, w2_ref, w3_ref, wout_ref,
                   b2_ref, b3_ref, bo_ref, out_ref,
                   sums_ref, row_buf, sem, *, seq_len, tile_b):
    """One batch tile: DMA-gather embedding rows + sum, then the 4-matmul MLP.

    ids_ref  : SMEM (scalar prefetch) flat int32 token ids, per-tile order
               (sentence, local batch row, seq position).
    emb_hbm  : (V, 1, H_pad) f32 embedding table left in HBM (pl.ANY).
    sums_ref : VMEM (2*tile_b, H_pad) f32 scratch; rows [0,tile_b) premise sums,
               rows [tile_b, 2*tile_b) hypothesis sums.
    row_buf  : VMEM (2, 1, H_pad) f32 double buffer for the gathered row.
    """
    f32 = jnp.float32
    n_rows = 2 * tile_b
    tok_per_tile = n_rows * seq_len
    base = pl.program_id(0) * tok_per_tile
    h_pad = row_buf.shape[-1]

    # ---- fused embedding gather + sum over sequence (manual double-buffered DMA) ----
    def fetch(local_t, slot):
        tok = ids_ref[base + local_t]
        pltpu.make_async_copy(emb_hbm.at[tok], row_buf.at[slot], sem.at[slot]).start()

    fetch(0, 0)  # prime the pipeline

    def row_body(n, carry):
        def tok_body(s, acc):
            local_t = n * seq_len + s
            slot = local_t & 1
            pltpu.make_async_copy(emb_hbm.at[0], row_buf.at[slot], sem.at[slot]).wait()

            @pl.when(local_t + 1 < tok_per_tile)
            def _():
                fetch(local_t + 1, 1 - slot)

            return acc + row_buf[slot]

        acc = lax.fori_loop(0, seq_len, tok_body,
                            jnp.zeros((1, h_pad), f32), unroll=True)
        sums_ref[pl.ds(n, 1), :] = acc
        return carry

    lax.fori_loop(0, n_rows, row_body, 0)

    # ---- MLP: eval-mode BN already folded into W2/W3/Wout + bias rows ----
    cdt = w1p_ref.dtype            # bf16 for the MXU path, f32 for the exactness check
    sums = sums_ref[...]
    p = sums[:tile_b, :].astype(cdt)
    h = sums[tile_b:, :].astype(cdt)

    dot = lambda a, w: jnp.dot(a, w, preferred_element_type=f32)
    # cat((p, h), 1) @ W1  ==  p @ W1[:H] + h @ W1[H:]   (bias=False, weights pre-split)
    a1 = jnp.maximum(dot(p, w1p_ref[...]) + dot(h, w1h_ref[...]), 0.0)
    a2 = jnp.maximum(dot(a1.astype(cdt), w2_ref[...]) + b2_ref[...], 0.0)
    a3 = jnp.maximum(dot(a2.astype(cdt), w3_ref[...]) + b3_ref[...], 0.0)
    out_ref[...] = jnp.tanh(dot(a3.astype(cdt), wout_ref[...]) + bo_ref[...])


def bow_nsp_forward(prem_ids, hyp_ids, params, *, use_bf16=True):
    """prem_ids / hyp_ids: (S, B) int32 token ids (torchtext seq-first layout)."""
    S, B = prem_ids.shape
    V, H = params["emb"].shape
    H2 = 2 * H
    f32 = jnp.float32
    cdt = jnp.bfloat16 if use_bf16 else f32

    TILE_B = 8                                   # sublane-aligned batch tile
    B_pad = _round_up(max(B, 1), TILE_B)
    num_tiles = B_pad // TILE_B
    H_pad = _round_up(H, 128)                    # lane-dense embedding / layer-1 K dim
    H2_pad = _round_up(H2, 128)
    OUT_PAD = 128                                # lane-dense final store (2 -> 128)

    # Token ids in per-tile processing order: (tile, sentence, local row, seq).
    def pad_ids(ids_sb):
        ids_bs = ids_sb.T.astype(jnp.int32)                      # (B, S)
        return jnp.zeros((B_pad, S), jnp.int32).at[:B].set(ids_bs)

    prem = pad_ids(prem_ids).reshape(num_tiles, TILE_B, S)
    hyp = pad_ids(hyp_ids).reshape(num_tiles, TILE_B, S)
    ids_flat = jnp.stack([prem, hyp], axis=1).reshape(-1)
    ids_flat = jnp.clip(ids_flat, 0, V - 1)      # mirror embedding-lookup index clamping

    # Frozen GloVe table: lane-padded, stays in HBM; rows DMA-gathered per token.
    emb = jnp.zeros((V, 1, H_pad), f32).at[:, 0, :H].set(params["emb"].astype(f32))

    # Eval-mode BatchNorm1d folded into the following Linear (scale -> weight rows,
    # shift -> bias row); layers are bias-free so this is exact.
    eps = 1e-5
    scale = (params["bn_gamma"] * lax.rsqrt(params["bn_var"] + eps)).astype(f32)  # (H2,)
    shift = (params["bn_beta"] - params["bn_mean"] * scale).astype(f32)           # (H2,)

    def pad_w(w, rows, cols, dtype):
        out = jnp.zeros((rows, cols), f32).at[:w.shape[0], :w.shape[1]].set(w.astype(f32))
        return out.astype(dtype)

    w1p = pad_w(params["w1p"], H_pad, H2_pad, cdt)
    w1h = pad_w(params["w1h"], H_pad, H2_pad, cdt)
    w2 = pad_w(params["w2"] * scale[:, None], H2_pad, H2_pad, cdt)
    w3 = pad_w(params["w3"] * scale[:, None], H2_pad, H2_pad, cdt)
    wout = pad_w(params["wout"] * scale[:, None], H2_pad, OUT_PAD, cdt)
    b2 = pad_w((shift @ params["w2"]).reshape(1, H2), 1, H2_pad, f32)
    b3 = pad_w((shift @ params["w3"]).reshape(1, H2), 1, H2_pad, f32)
    bo = pad_w((shift @ params["wout"]).reshape(1, -1), 1, OUT_PAD, f32)

    kernel = functools.partial(bow_nsp_kernel, seq_len=S, tile_b=TILE_B)

    grid_spec = pltpu.PrefetchScalarGridSpec(
        num_scalar_prefetch=1,                   # ids -> SMEM, used for DMA addressing
        grid=(num_tiles,),
        in_specs=[
            pl.BlockSpec(memory_space=pl.ANY),                       # emb (stays in HBM)
            pl.BlockSpec((H_pad, H2_pad), lambda i, ids: (0, 0)),    # w1p
            pl.BlockSpec((H_pad, H2_pad), lambda i, ids: (0, 0)),    # w1h
            pl.BlockSpec((H2_pad, H2_pad), lambda i, ids: (0, 0)),   # w2 (BN-folded)
            pl.BlockSpec((H2_pad, H2_pad), lambda i, ids: (0, 0)),   # w3 (BN-folded)
            pl.BlockSpec((H2_pad, OUT_PAD), lambda i, ids: (0, 0)),  # wout (BN-folded)
            pl.BlockSpec((1, H2_pad), lambda i, ids: (0, 0)),        # b2
            pl.BlockSpec((1, H2_pad), lambda i, ids: (0, 0)),        # b3
            pl.BlockSpec((1, OUT_PAD), lambda i, ids: (0, 0)),       # bo
        ],
        out_specs=pl.BlockSpec((TILE_B, OUT_PAD), lambda i, ids: (i, 0)),
        scratch_shapes=[
            pltpu.VMEM((2 * TILE_B, H_pad), f32),   # per-row embedding sums
            pltpu.VMEM((2, 1, H_pad), f32),         # double-buffered gathered row
            pltpu.SemaphoreType.DMA((2,)),
        ],
    )

    out_padded = pl.pallas_call(
        kernel,
        out_shape=jax.ShapeDtypeStruct((B_pad, OUT_PAD), f32),
        grid_spec=grid_spec,
        compiler_params=pltpu.CompilerParams(
            dimension_semantics=("parallel",),      # batch tiles shard across v7x's 2 TCs
            vmem_limit_bytes=32 * 1024 * 1024,      # fits v5e/v6e/v7x scoped-VMEM budgets
        ),
    )(ids_flat, emb, w1p, w1h, w2, w3, wout, b2, b3, bo)
    return out_padded[:B, :2]                       # (B, 2) logits after tanh


def reference_forward(prem_ids, hyp_ids, params):
    """Pure-JAX replica of BoW_for_NSP.forward (eval mode)."""
    emb = params["emb"]
    p = jnp.take(emb, prem_ids, axis=0).sum(axis=0)           # (B, H)
    h = jnp.take(emb, hyp_ids, axis=0).sum(axis=0)            # (B, H)
    x = jnp.concatenate([p, h], axis=1)                       # (B, 2H)

    w1 = jnp.concatenate([params["w1p"], params["w1h"]], axis=0)
    relu = lambda v: jnp.maximum(v, 0.0)
    eps = 1e-5

    def bn(v):
        return ((v - params["bn_mean"]) / jnp.sqrt(params["bn_var"] + eps)
                * params["bn_gamma"] + params["bn_beta"])

    x = bn(relu(x @ w1))                  # dropout = identity in eval mode
    x = bn(relu(x @ params["w2"]))
    x = bn(relu(x @ params["w3"]))
    return jnp.tanh(x @ params["wout"])


if __name__ == "__main__":
    # seq len, batch, hidden (= embedding_dim), vocab
    S, B, H, V = 8, 2, 32, 64
    H2 = 2 * H

    key = jax.random.PRNGKey(0)
    ks = jax.random.split(key, 12)

    emb = jax.random.normal(ks[0], (V, H), jnp.float32) * 0.1

    def lin_w(k, d_in, d_out):
        # torch nn.Linear weight is (out, in); we pass it pre-transposed (in, out).
        s = 1.0 / jnp.sqrt(d_in)
        return jax.random.uniform(k, (d_in, d_out), jnp.float32, -s, s)

    w1 = lin_w(ks[1], H2, H2)        # linear_1 (bias=False)
    w2 = lin_w(ks[2], H2, H2)        # linear_2 (bias=False)
    w3 = lin_w(ks[3], H2, H2)        # linear_3 (bias=False)
    wout = lin_w(ks[4], H2, 2)       # linear_out (bias=False)

    bn_gamma = jax.random.uniform(ks[5], (H2,), jnp.float32, 0.5, 1.5)
    bn_beta = jax.random.uniform(ks[6], (H2,), jnp.float32, -0.1, 0.1)
    bn_mean = jax.random.normal(ks[7], (H2,), jnp.float32) * 0.1
    bn_var = jax.random.uniform(ks[8], (H2,), jnp.float32, 0.5, 1.5)

    params = dict(
        emb=emb,
        w1p=w1[:H, :], w1h=w1[H:, :],     # split for the in-kernel concat trick
        w2=w2, w3=w3, wout=wout,
        bn_gamma=bn_gamma, bn_beta=bn_beta, bn_mean=bn_mean, bn_var=bn_var,
    )

    prem_ids = jax.random.randint(ks[9], (S, B), 0, V)    # x.premise[0]
    hyp_ids = jax.random.randint(ks[10], (S, B), 0, V)    # x.hypothesis[0]

    ref = reference_forward(prem_ids, hyp_ids, params)

    # Exactness check: f32 MXU operands, same kernel / gather path.
    out_f32 = bow_nsp_forward(prem_ids, hyp_ids, params, use_bf16=False)
    jax.block_until_ready(out_f32)
    assert out_f32.shape == (B, 2), out_f32.shape
    assert jnp.allclose(out_f32, ref, rtol=1e-3, atol=1e-3), (out_f32, ref)

    # Production path: bf16 MXU operands with f32 accumulation (native on v5e/v6e/v7x).
    # Looser tolerance only reflects bf16 operand rounding; structure is identical.
    out = bow_nsp_forward(prem_ids, hyp_ids, params)
    jax.block_until_ready(out)
    assert out.shape == (B, 2), out.shape
    assert jnp.allclose(out, ref, rtol=2e-2, atol=2e-2), (out, ref)

    print("KERNEL_OK")
</pallas_src>

<mosaic_0001>
module attributes {stable_mosaic.version = 11 : i64} {
  func.func @bow_nsp_kernel(%arg0: i32, %arg1: memref<128xi32, #tpu.memory_space<smem>>, %arg2: memref<64x1x128xf32, #tpu.memory_space<any>>, %arg3: memref<128x128xf32, #tpu.memory_space<vmem>>, %arg4: memref<128x128xf32, #tpu.memory_space<vmem>>, %arg5: memref<128x128xf32, #tpu.memory_space<vmem>>, %arg6: memref<128x128xf32, #tpu.memory_space<vmem>>, %arg7: memref<128x128xf32, #tpu.memory_space<vmem>>, %arg8: memref<1x128xf32, #tpu.memory_space<vmem>>, %arg9: memref<1x128xf32, #tpu.memory_space<vmem>>, %arg10: memref<1x128xf32, #tpu.memory_space<vmem>>, %arg11: memref<8x128xf32, #tpu.memory_space<vmem>>, %arg12: memref<16x128xf32, #tpu.memory_space<vmem>>, %arg13: memref<2x1x128xf32, #tpu.memory_space<vmem>>, %arg14: memref<2x!tpu.dma_semaphore, #tpu.memory_space<semaphore_mem>>) attributes {dimension_semantics = [#tpu.dimension_semantics<parallel>], iteration_bounds = array<i64: 1>, scalar_prefetch = 1 : i64, scratch_operands = 3 : i64, tpu.core_type = #tpu.core_type<tc>, window_params = [{}, {pipeline_mode = #tpu.pipeline_mode<synchronous>, transform_indices = @transform_1, window_bounds = array<i64: 128, 128>}, {pipeline_mode = #tpu.pipeline_mode<synchronous>, transform_indices = @transform_2, window_bounds = array<i64: 128, 128>}, {pipeline_mode = #tpu.pipeline_mode<synchronous>, transform_indices = @transform_3, window_bounds = array<i64: 128, 128>}, {pipeline_mode = #tpu.pipeline_mode<synchronous>, transform_indices = @transform_4, window_bounds = array<i64: 128, 128>}, {pipeline_mode = #tpu.pipeline_mode<synchronous>, transform_indices = @transform_5, window_bounds = array<i64: 128, 128>}, {pipeline_mode = #tpu.pipeline_mode<synchronous>, transform_indices = @transform_6, window_bounds = array<i64: 1, 128>}, {pipeline_mode = #tpu.pipeline_mode<synchronous>, transform_indices = @transform_7, window_bounds = array<i64: 1, 128>}, {pipeline_mode = #tpu.pipeline_mode<synchronous>, transform_indices = @transform_8, window_bounds = array<i64: 1, 128>}, {transform_indices = @transform_9, window_bounds = array<i64: 8, 128>}]} {
    %c128_i32 = arith.constant 128 : i32
    %0 = arith.muli %arg0, %c128_i32 : i32
    %c0_i32 = arith.constant 0 : i32
    %1 = arith.addi %0, %c0_i32 : i32
    %2 = arith.index_cast %1 : i32 to index
    %3 = memref.load %arg1[%2] : memref<128xi32, #tpu.memory_space<smem>>
    %c0_i32_0 = arith.constant 0 : i32
    %c0_i32_1 = arith.constant 0 : i32
    %c0_i32_2 = arith.constant 0 : i32
    %c0_i32_3 = arith.constant 0 : i32
    %4 = tpu.memref_slice %arg2[%3, %c0_i32_2, %c0_i32_3] : memref<64x1x128xf32, #tpu.memory_space<any>> -> memref<1x1x128xf32, #tpu.memory_space<any>>
    %5 = tpu.memref_squeeze %4 : memref<1x1x128xf32, #tpu.memory_space<any>> -> memref<1x128xf32, #tpu.memory_space<any>>
    %c0_i32_4 = arith.constant 0 : i32
    %c0_i32_5 = arith.constant 0 : i32
    %6 = tpu.memref_slice %arg13[%c0_i32_0, %c0_i32_4, %c0_i32_5] : memref<2x1x128xf32, #tpu.memory_space<vmem>> -> memref<1x1x128xf32, #tpu.memory_space<vmem>>
    %7 = tpu.memref_squeeze %6 : memref<1x1x128xf32, #tpu.memory_space<vmem>> -> memref<1x128xf32, #tpu.memory_space<vmem>>
    %8 = tpu.memref_slice %arg14[%c0_i32_1] : memref<2x!tpu.dma_semaphore, #tpu.memory_space<semaphore_mem>> -> memref<1x!tpu.dma_semaphore, #tpu.memory_space<semaphore_mem>>
    %9 = tpu.memref_squeeze %8 : memref<1x!tpu.dma_semaphore, #tpu.memory_space<semaphore_mem>> -> memref<!tpu.dma_semaphore, #tpu.memory_space<semaphore_mem>>
    tpu.enqueue_dma source(%5 : memref<1x128xf32, #tpu.memory_space<any>>) target(%7 : memref<1x128xf32, #tpu.memory_space<vmem>>) target_semaphore(%9 : memref<!tpu.dma_semaphore, #tpu.memory_space<semaphore_mem>>)
    %c0_i32_6 = arith.constant 0 : i32
    %c16_i32 = arith.constant 16 : i32
    %10 = arith.addi %c0_i32_6, %c16_i32 : i32
    %c1_i32 = arith.constant 1 : i32
    scf.for %arg15 = %c0_i32_6 to %10 step %c1_i32  : i32 {
      %cst_34 = arith.constant 0.000000e+00 : f32
      %42 = vector.broadcast %cst_34 : f32 to vector<1x128xf32>
      %c0_i32_35 = arith.constant 0 : i32
      %c8_i32 = arith.constant 8 : i32
      %43 = arith.muli %arg15, %c8_i32 : i32
      %44 = arith.addi %43, %c0_i32_35 : i32
      %c1_i32_36 = arith.constant 1 : i32
      %45 = arith.andi %44, %c1_i32_36 : i32
      %c0_i32_37 = arith.constant 0 : i32
      %c0_i32_38 = arith.constant 0 : i32
      %c0_i32_39 = arith.constant 0 : i32
      %46 = tpu.memref_slice %arg2[%c0_i32_37, %c0_i32_38, %c0_i32_39] : memref<64x1x128xf32, #tpu.memory_space<any>> -> memref<1x1x128xf32, #tpu.memory_space<any>>
      %47 = tpu.memref_squeeze %46 : memref<1x1x128xf32, #tpu.memory_space<any>> -> memref<1x128xf32, #tpu.memory_space<any>>
      %c0_i32_40 = arith.constant 0 : i32
      %c0_i32_41 = arith.constant 0 : i32
      %48 = tpu.memref_slice %arg13[%45, %c0_i32_40, %c0_i32_41] : memref<2x1x128xf32, #tpu.memory_space<vmem>> -> memref<1x1x128xf32, #tpu.memory_space<vmem>>
      %49 = tpu.memref_squeeze %48 : memref<1x1x128xf32, #tpu.memory_space<vmem>> -> memref<1x128xf32, #tpu.memory_space<vmem>>
      %50 = tpu.memref_slice %arg14[%45] : memref<2x!tpu.dma_semaphore, #tpu.memory_space<semaphore_mem>> -> memref<1x!tpu.dma_semaphore, #tpu.memory_space<semaphore_mem>>
      %51 = tpu.memref_squeeze %50 : memref<1x!tpu.dma_semaphore, #tpu.memory_space<semaphore_mem>> -> memref<!tpu.dma_semaphore, #tpu.memory_space<semaphore_mem>>
      tpu.wait_dma2 semaphore(%51 : memref<!tpu.dma_semaphore, #tpu.memory_space<semaphore_mem>>) src(%47 : memref<1x128xf32, #tpu.memory_space<any>>) dst(%49 : memref<1x128xf32, #tpu.memory_space<vmem>>)
      %c1_i32_42 = arith.constant 1 : i32
      %52 = arith.addi %44, %c1_i32_42 : i32
      %c128_i32_43 = arith.constant 128 : i32
      %53 = arith.cmpi slt, %52, %c128_i32_43 : i32
      %54 = arith.extui %53 : i1 to i32
      %c0_i32_44 = arith.constant 0 : i32
      %55 = arith.cmpi ne, %54, %c0_i32_44 : i32
      scf.if %55 {
        %c1_i32_134 = arith.constant 1 : i32
        %181 = arith.addi %44, %c1_i32_134 : i32
        %c1_i32_135 = arith.constant 1 : i32
        %182 = arith.subi %c1_i32_135, %45 : i32
        %183 = arith.addi %0, %181 : i32
        %184 = arith.index_cast %183 : i32 to index
        %185 = memref.load %arg1[%184] : memref<128xi32, #tpu.memory_space<smem>>
        %c0_i32_136 = arith.constant 0 : i32
        %c0_i32_137 = arith.constant 0 : i32
        %186 = tpu.memref_slice %arg2[%185, %c0_i32_136, %c0_i32_137] : memref<64x1x128xf32, #tpu.memory_space<any>> -> memref<1x1x128xf32, #tpu.memory_space<any>>
        %187 = tpu.memref_squeeze %186 : memref<1x1x128xf32, #tpu.memory_space<any>> -> memref<1x128xf32, #tpu.memory_space<any>>
        %c0_i32_138 = arith.constant 0 : i32
        %c0_i32_139 = arith.constant 0 : i32
        %188 = tpu.memref_slice %arg13[%182, %c0_i32_138, %c0_i32_139] : memref<2x1x128xf32, #tpu.memory_space<vmem>> -> memref<1x1x128xf32, #tpu.memory_space<vmem>>
        %189 = tpu.memref_squeeze %188 : memref<1x1x128xf32, #tpu.memory_space<vmem>> -> memref<1x128xf32, #tpu.memory_space<vmem>>
        %190 = tpu.memref_slice %arg14[%182] : memref<2x!tpu.dma_semaphore, #tpu.memory_space<semaphore_mem>> -> memref<1x!tpu.dma_semaphore, #tpu.memory_space<semaphore_mem>>
        %191 = tpu.memref_squeeze %190 : memref<1x!tpu.dma_semaphore, #tpu.memory_space<semaphore_mem>> -> memref<!tpu.dma_semaphore, #tpu.memory_space<semaphore_mem>>
        tpu.enqueue_dma source(%187 : memref<1x128xf32, #tpu.memory_space<any>>) target(%189 : memref<1x128xf32, #tpu.memory_space<vmem>>) target_semaphore(%191 : memref<!tpu.dma_semaphore, #tpu.memory_space<semaphore_mem>>)
      } else {
      }
      %56 = arith.index_cast %45 : i32 to index
      %c0_45 = arith.constant 0 : index
      %c0_46 = arith.constant 0 : index
      %57 = vector.load %arg13[%56, %c0_45, %c0_46] : memref<2x1x128xf32, #tpu.memory_space<vmem>>, vector<1x1x128xf32>
      %58 = vector.shape_cast %57 : vector<1x1x128xf32> to vector<1x128xf32>
      %59 = arith.addf %42, %58 : vector<1x128xf32>
      %c1_i32_47 = arith.constant 1 : i32
      %c8_i32_48 = arith.constant 8 : i32
      %60 = arith.muli %arg15, %c8_i32_48 : i32
      %61 = arith.addi %60, %c1_i32_47 : i32
      %c1_i32_49 = arith.constant 1 : i32
      %62 = arith.andi %61, %c1_i32_49 : i32
      %c0_i32_50 = arith.constant 0 : i32
      %c0_i32_51 = arith.constant 0 : i32
      %c0_i32_52 = arith.constant 0 : i32
      %63 = tpu.memref_slice %arg2[%c0_i32_50, %c0_i32_51, %c0_i32_52] : memref<64x1x128xf32, #tpu.memory_space<any>> -> memref<1x1x128xf32, #tpu.memory_space<any>>
      %64 = tpu.memref_squeeze %63 : memref<1x1x128xf32, #tpu.memory_space<any>> -> memref<1x128xf32, #tpu.memory_space<any>>
      %c0_i32_53 = arith.constant 0 : i32
      %c0_i32_54 = arith.constant 0 : i32
      %65 = tpu.memref_slice %arg13[%62, %c0_i32_53, %c0_i32_54] : memref<2x1x128xf32, #tpu.memory_space<vmem>> -> memref<1x1x128xf32, #tpu.memory_space<vmem>>
      %66 = tpu.memref_squeeze %65 : memref<1x1x128xf32, #tpu.memory_space<vmem>> -> memref<1x128xf32, #tpu.memory_space<vmem>>
      %67 = tpu.memref_slice %arg14[%62] : memref<2x!tpu.dma_semaphore, #tpu.memory_space<semaphore_mem>> -> memref<1x!tpu.dma_semaphore, #tpu.memory_space<semaphore_mem>>
      %68 = tpu.memref_squeeze %67 : memref<1x!tpu.dma_semaphore, #tpu.memory_space<semaphore_mem>> -> memref<!tpu.dma_semaphore, #tpu.memory_space<semaphore_mem>>
      tpu.wait_dma2 semaphore(%68 : memref<!tpu.dma_semaphore, #tpu.memory_space<semaphore_mem>>) src(%64 : memref<1x128xf32, #tpu.memory_space<any>>) dst(%66 : memref<1x128xf32, #tpu.memory_space<vmem>>)
      %c1_i32_55 = arith.constant 1 : i32
      %69 = arith.addi %61, %c1_i32_55 : i32
      %c128_i32_56 = arith.constant 128 : i32
      %70 = arith.cmpi slt, %69, %c128_i32_56 : i32
      %71 = arith.extui %70 : i1 to i32
      %c0_i32_57 = arith.constant 0 : i32
      %72 = arith.cmpi ne, %71, %c0_i32_57 : i32
      scf.if %72 {
        %c1_i32_134 = arith.constant 1 : i32
        %181 = arith.addi %61, %c1_i32_134 : i32
        %c1_i32_135 = arith.constant 1 : i32
        %182 = arith.subi %c1_i32_135, %62 : i32
        %183 = arith.addi %0, %181 : i32
        %184 = arith.index_cast %183 : i32 to index
        %185 = memref.load %arg1[%184] : memref<128xi32, #tpu.memory_space<smem>>
        %c0_i32_136 = arith.constant 0 : i32
        %c0_i32_137 = arith.constant 0 : i32
        %186 = tpu.memref_slice %arg2[%185, %c0_i32_136, %c0_i32_137] : memref<64x1x128xf32, #tpu.memory_space<any>> -> memref<1x1x128xf32, #tpu.memory_space<any>>
        %187 = tpu.memref_squeeze %186 : memref<1x1x128xf32, #tpu.memory_space<any>> -> memref<1x128xf32, #tpu.memory_space<any>>
        %c0_i32_138 = arith.constant 0 : i32
        %c0_i32_139 = arith.constant 0 : i32
        %188 = tpu.memref_slice %arg13[%182, %c0_i32_138, %c0_i32_139] : memref<2x1x128xf32, #tpu.memory_space<vmem>> -> memref<1x1x128xf32, #tpu.memory_space<vmem>>
        %189 = tpu.memref_squeeze %188 : memref<1x1x128xf32, #tpu.memory_space<vmem>> -> memref<1x128xf32, #tpu.memory_space<vmem>>
        %190 = tpu.memref_slice %arg14[%182] : memref<2x!tpu.dma_semaphore, #tpu.memory_space<semaphore_mem>> -> memref<1x!tpu.dma_semaphore, #tpu.memory_space<semaphore_mem>>
        %191 = tpu.memref_squeeze %190 : memref<1x!tpu.dma_semaphore, #tpu.memory_space<semaphore_mem>> -> memref<!tpu.dma_semaphore, #tpu.memory_space<semaphore_mem>>
        tpu.enqueue_dma source(%187 : memref<1x128xf32, #tpu.memory_space<any>>) target(%189 : memref<1x128xf32, #tpu.memory_space<vmem>>) target_semaphore(%191 : memref<!tpu.dma_semaphore, #tpu.memory_space<semaphore_mem>>)
      } else {
      }
      %73 = arith.index_cast %62 : i32 to index
      %c0_58 = arith.constant 0 : index
      %c0_59 = arith.constant 0 : index
      %74 = vector.load %arg13[%73, %c0_58, %c0_59] : memref<2x1x128xf32, #tpu.memory_space<vmem>>, vector<1x1x128xf32>
      %75 = vector.shape_cast %74 : vector<1x1x128xf32> to vector<1x128xf32>
      %76 = arith.addf %59, %75 : vector<1x128xf32>
      %c2_i32 = arith.constant 2 : i32
      %c8_i32_60 = arith.constant 8 : i32
      %77 = arith.muli %arg15, %c8_i32_60 : i32
      %78 = arith.addi %77, %c2_i32 : i32
      %c1_i32_61 = arith.constant 1 : i32
      %79 = arith.andi %78, %c1_i32_61 : i32
      %c0_i32_62 = arith.constant 0 : i32
      %c0_i32_63 = arith.constant 0 : i32
      %c0_i32_64 = arith.constant 0 : i32
      %80 = tpu.memref_slice %arg2[%c0_i32_62, %c0_i32_63, %c0_i32_64] : memref<64x1x128xf32, #tpu.memory_space<any>> -> memref<1x1x128xf32, #tpu.memory_space<any>>
      %81 = tpu.memref_squeeze %80 : memref<1x1x128xf32, #tpu.memory_space<any>> -> memref<1x128xf32, #tpu.memory_space<any>>
      %c0_i32_65 = arith.constant 0 : i32
      %c0_i32_66 = arith.constant 0 : i32
      %82 = tpu.memref_slice %arg13[%79, %c0_i32_65, %c0_i32_66] : memref<2x1x128xf32, #tpu.memory_space<vmem>> -> memref<1x1x128xf32, #tpu.memory_space<vmem>>
      %83 = tpu.memref_squeeze %82 : memref<1x1x128xf32, #tpu.memory_space<vmem>> -> memref<1x128xf32, #tpu.memory_space<vmem>>
      %84 = tpu.memref_slice %arg14[%79] : memref<2x!tpu.dma_semaphore, #tpu.memory_space<semaphore_mem>> -> memref<1x!tpu.dma_semaphore, #tpu.memory_space<semaphore_mem>>
      %85 = tpu.memref_squeeze %84 : memref<1x!tpu.dma_semaphore, #tpu.memory_space<semaphore_mem>> -> memref<!tpu.dma_semaphore, #tpu.memory_space<semaphore_mem>>
      tpu.wait_dma2 semaphore(%85 : memref<!tpu.dma_semaphore, #tpu.memory_space<semaphore_mem>>) src(%81 : memref<1x128xf32, #tpu.memory_space<any>>) dst(%83 : memref<1x128xf32, #tpu.memory_space<vmem>>)
      %c1_i32_67 = arith.constant 1 : i32
      %86 = arith.addi %78, %c1_i32_67 : i32
      %c128_i32_68 = arith.constant 128 : i32
      %87 = arith.cmpi slt, %86, %c128_i32_68 : i32
      %88 = arith.extui %87 : i1 to i32
      %c0_i32_69 = arith.constant 0 : i32
      %89 = arith.cmpi ne, %88, %c0_i32_69 : i32
      scf.if %89 {
        %c1_i32_134 = arith.constant 1 : i32
        %181 = arith.addi %78, %c1_i32_134 : i32
        %c1_i32_135 = arith.constant 1 : i32
        %182 = arith.subi %c1_i32_135, %79 : i32
        %183 = arith.addi %0, %181 : i32
        %184 = arith.index_cast %183 : i32 to index
        %185 = memref.load %arg1[%184] : memref<128xi32, #tpu.memory_space<smem>>
        %c0_i32_136 = arith.constant 0 : i32
        %c0_i32_137 = arith.constant 0 : i32
        %186 = tpu.memref_slice %arg2[%185, %c0_i32_136, %c0_i32_137] : memref<64x1x128xf32, #tpu.memory_space<any>> -> memref<1x1x128xf32, #tpu.memory_space<any>>
        %187 = tpu.memref_squeeze %186 : memref<1x1x128xf32, #tpu.memory_space<any>> -> memref<1x128xf32, #tpu.memory_space<any>>
        %c0_i32_138 = arith.constant 0 : i32
        %c0_i32_139 = arith.constant 0 : i32
        %188 = tpu.memref_slice %arg13[%182, %c0_i32_138, %c0_i32_139] : memref<2x1x128xf32, #tpu.memory_space<vmem>> -> memref<1x1x128xf32, #tpu.memory_space<vmem>>
        %189 = tpu.memref_squeeze %188 : memref<1x1x128xf32, #tpu.memory_space<vmem>> -> memref<1x128xf32, #tpu.memory_space<vmem>>
        %190 = tpu.memref_slice %arg14[%182] : memref<2x!tpu.dma_semaphore, #tpu.memory_space<semaphore_mem>> -> memref<1x!tpu.dma_semaphore, #tpu.memory_space<semaphore_mem>>
        %191 = tpu.memref_squeeze %190 : memref<1x!tpu.dma_semaphore, #tpu.memory_space<semaphore_mem>> -> memref<!tpu.dma_semaphore, #tpu.memory_space<semaphore_mem>>
        tpu.enqueue_dma source(%187 : memref<1x128xf32, #tpu.memory_space<any>>) target(%189 : memref<1x128xf32, #tpu.memory_space<vmem>>) target_semaphore(%191 : memref<!tpu.dma_semaphore, #tpu.memory_space<semaphore_mem>>)
      } else {
      }
      %90 = arith.index_cast %79 : i32 to index
      %c0_70 = arith.constant 0 : index
      %c0_71 = arith.constant 0 : index
      %91 = vector.load %arg13[%90, %c0_70, %c0_71] : memref<2x1x128xf32, #tpu.memory_space<vmem>>, vector<1x1x128xf32>
      %92 = vector.shape_cast %91 : vector<1x1x128xf32> to vector<1x128xf32>
      %93 = arith.addf %76, %92 : vector<1x128xf32>
      %c3_i32 = arith.constant 3 : i32
      %c8_i32_72 = arith.constant 8 : i32
      %94 = arith.muli %arg15, %c8_i32_72 : i32
      %95 = arith.addi %94, %c3_i32 : i32
      %c1_i32_73 = arith.constant 1 : i32
      %96 = arith.andi %95, %c1_i32_73 : i32
      %c0_i32_74 = arith.constant 0 : i32
      %c0_i32_75 = arith.constant 0 : i32
      %c0_i32_76 = arith.constant 0 : i32
      %97 = tpu.memref_slice %arg2[%c0_i32_74, %c0_i32_75, %c0_i32_76] : memref<64x1x128xf32, #tpu.memory_space<any>> -> memref<1x1x128xf32, #tpu.memory_space<any>>
      %98 = tpu.memref_squeeze %97 : memref<1x1x128xf32, #tpu.memory_space<any>> -> memref<1x128xf32, #tpu.memory_space<any>>
      %c0_i32_77 = arith.constant 0 : i32
      %c0_i32_78 = arith.constant 0 : i32
      %99 = tpu.memref_slice %arg13[%96, %c0_i32_77, %c0_i32_78] : memref<2x1x128xf32, #tpu.memory_space<vmem>> -> memref<1x1x128xf32, #tpu.memory_space<vmem>>
      %100 = tpu.memref_squeeze %99 : memref<1x1x128xf32, #tpu.memory_space<vmem>> -> memref<1x128xf32, #tpu.memory_space<vmem>>
      %101 = tpu.memref_slice %arg14[%96] : memref<2x!tpu.dma_semaphore, #tpu.memory_space<semaphore_mem>> -> memref<1x!tpu.dma_semaphore, #tpu.memory_space<semaphore_mem>>
      %102 = tpu.memref_squeeze %101 : memref<1x!tpu.dma_semaphore, #tpu.memory_space<semaphore_mem>> -> memref<!tpu.dma_semaphore, #tpu.memory_space<semaphore_mem>>
      tpu.wait_dma2 semaphore(%102 : memref<!tpu.dma_semaphore, #tpu.memory_space<semaphore_mem>>) src(%98 : memref<1x128xf32, #tpu.memory_space<any>>) dst(%100 : memref<1x128xf32, #tpu.memory_space<vmem>>)
      %c1_i32_79 = arith.constant 1 : i32
      %103 = arith.addi %95, %c1_i32_79 : i32
      %c128_i32_80 = arith.constant 128 : i32
      %104 = arith.cmpi slt, %103, %c128_i32_80 : i32
      %105 = arith.extui %104 : i1 to i32
      %c0_i32_81 = arith.constant 0 : i32
      %106 = arith.cmpi ne, %105, %c0_i32_81 : i32
      scf.if %106 {
        %c1_i32_134 = arith.constant 1 : i32
        %181 = arith.addi %95, %c1_i32_134 : i32
        %c1_i32_135 = arith.constant 1 : i32
        %182 = arith.subi %c1_i32_135, %96 : i32
        %183 = arith.addi %0, %181 : i32
        %184 = arith.index_cast %183 : i32 to index
        %185 = memref.load %arg1[%184] : memref<128xi32, #tpu.memory_space<smem>>
        %c0_i32_136 = arith.constant 0 : i32
        %c0_i32_137 = arith.constant 0 : i32
        %186 = tpu.memref_slice %arg2[%185, %c0_i32_136, %c0_i32_137] : memref<64x1x128xf32, #tpu.memory_space<any>> -> memref<1x1x128xf32, #tpu.memory_space<any>>
        %187 = tpu.memref_squeeze %186 : memref<1x1x128xf32, #tpu.memory_space<any>> -> memref<1x128xf32, #tpu.memory_space<any>>
        %c0_i32_138 = arith.constant 0 : i32
        %c0_i32_139 = arith.constant 0 : i32
        %188 = tpu.memref_slice %arg13[%182, %c0_i32_138, %c0_i32_139] : memref<2x1x128xf32, #tpu.memory_space<vmem>> -> memref<1x1x128xf32, #tpu.memory_space<vmem>>
        %189 = tpu.memref_squeeze %188 : memref<1x1x128xf32, #tpu.memory_space<vmem>> -> memref<1x128xf32, #tpu.memory_space<vmem>>
        %190 = tpu.memref_slice %arg14[%182] : memref<2x!tpu.dma_semaphore, #tpu.memory_space<semaphore_mem>> -> memref<1x!tpu.dma_semaphore, #tpu.memory_space<semaphore_mem>>
        %191 = tpu.memref_squeeze %190 : memref<1x!tpu.dma_semaphore, #tpu.memory_space<semaphore_mem>> -> memref<!tpu.dma_semaphore, #tpu.memory_space<semaphore_mem>>
        tpu.enqueue_dma source(%187 : memref<1x128xf32, #tpu.memory_space<any>>) target(%189 : memref<1x128xf32, #tpu.memory_space<vmem>>) target_semaphore(%191 : memref<!tpu.dma_semaphore, #tpu.memory_space<semaphore_mem>>)
      } else {
      }
      %107 = arith.index_cast %96 : i32 to index
      %c0_82 = arith.constant 0 : index
      %c0_83 = arith.constant 0 : index
      %108 = vector.load %arg13[%107, %c0_82, %c0_83] : memref<2x1x128xf32, #tpu.memory_space<vmem>>, vector<1x1x128xf32>
      %109 = vector.shape_cast %108 : vector<1x1x128xf32> to vector<1x128xf32>
      %110 = arith.addf %93, %109 : vector<1x128xf32>
      %c4_i32 = arith.constant 4 : i32
      %c8_i32_84 = arith.constant 8 : i32
      %111 = arith.muli %arg15, %c8_i32_84 : i32
      %112 = arith.addi %111, %c4_i32 : i32
      %c1_i32_85 = arith.constant 1 : i32
      %113 = arith.andi %112, %c1_i32_85 : i32
      %c0_i32_86 = arith.constant 0 : i32
      %c0_i32_87 = arith.constant 0 : i32
      %c0_i32_88 = arith.constant 0 : i32
      %114 = tpu.memref_slice %arg2[%c0_i32_86, %c0_i32_87, %c0_i32_88] : memref<64x1x128xf32, #tpu.memory_space<any>> -> memref<1x1x128xf32, #tpu.memory_space<any>>
      %115 = tpu.memref_squeeze %114 : memref<1x1x128xf32, #tpu.memory_space<any>> -> memref<1x128xf32, #tpu.memory_space<any>>
      %c0_i32_89 = arith.constant 0 : i32
      %c0_i32_90 = arith.constant 0 : i32
      %116 = tpu.memref_slice %arg13[%113, %c0_i32_89, %c0_i32_90] : memref<2x1x128xf32, #tpu.memory_space<vmem>> -> memref<1x1x128xf32, #tpu.memory_space<vmem>>
      %117 = tpu.memref_squeeze %116 : memref<1x1x128xf32, #tpu.memory_space<vmem>> -> memref<1x128xf32, #tpu.memory_space<vmem>>
      %118 = tpu.memref_slice %arg14[%113] : memref<2x!tpu.dma_semaphore, #tpu.memory_space<semaphore_mem>> -> memref<1x!tpu.dma_semaphore, #tpu.memory_space<semaphore_mem>>
      %119 = tpu.memref_squeeze %118 : memref<1x!tpu.dma_semaphore, #tpu.memory_space<semaphore_mem>> -> memref<!tpu.dma_semaphore, #tpu.memory_space<semaphore_mem>>
      tpu.wait_dma2 semaphore(%119 : memref<!tpu.dma_semaphore, #tpu.memory_space<semaphore_mem>>) src(%115 : memref<1x128xf32, #tpu.memory_space<any>>) dst(%117 : memref<1x128xf32, #tpu.memory_space<vmem>>)
      %c1_i32_91 = arith.constant 1 : i32
      %120 = arith.addi %112, %c1_i32_91 : i32
      %c128_i32_92 = arith.constant 128 : i32
      %121 = arith.cmpi slt, %120, %c128_i32_92 : i32
      %122 = arith.extui %121 : i1 to i32
      %c0_i32_93 = arith.constant 0 : i32
      %123 = arith.cmpi ne, %122, %c0_i32_93 : i32
      scf.if %123 {
        %c1_i32_134 = arith.constant 1 : i32
        %181 = arith.addi %112, %c1_i32_134 : i32
        %c1_i32_135 = arith.constant 1 : i32
        %182 = arith.subi %c1_i32_135, %113 : i32
        %183 = arith.addi %0, %181 : i32
        %184 = arith.index_cast %183 : i32 to index
        %185 = memref.load %arg1[%184] : memref<128xi32, #tpu.memory_space<smem>>
        %c0_i32_136 = arith.constant 0 : i32
        %c0_i32_137 = arith.constant 0 : i32
        %186 = tpu.memref_slice %arg2[%185, %c0_i32_136, %c0_i32_137] : memref<64x1x128xf32, #tpu.memory_space<any>> -> memref<1x1x128xf32, #tpu.memory_space<any>>
        %187 = tpu.memref_squeeze %186 : memref<1x1x128xf32, #tpu.memory_space<any>> -> memref<1x128xf32, #tpu.memory_space<any>>
        %c0_i32_138 = arith.constant 0 : i32
        %c0_i32_139 = arith.constant 0 : i32
        %188 = tpu.memref_slice %arg13[%182, %c0_i32_138, %c0_i32_139] : memref<2x1x128xf32, #tpu.memory_space<vmem>> -> memref<1x1x128xf32, #tpu.memory_space<vmem>>
        %189 = tpu.memref_squeeze %188 : memref<1x1x128xf32, #tpu.memory_space<vmem>> -> memref<1x128xf32, #tpu.memory_space<vmem>>
        %190 = tpu.memref_slice %arg14[%182] : memref<2x!tpu.dma_semaphore, #tpu.memory_space<semaphore_mem>> -> memref<1x!tpu.dma_semaphore, #tpu.memory_space<semaphore_mem>>
        %191 = tpu.memref_squeeze %190 : memref<1x!tpu.dma_semaphore, #tpu.memory_space<semaphore_mem>> -> memref<!tpu.dma_semaphore, #tpu.memory_space<semaphore_mem>>
        tpu.enqueue_dma source(%187 : memref<1x128xf32, #tpu.memory_space<any>>) target(%189 : memref<1x128xf32, #tpu.memory_space<vmem>>) target_semaphore(%191 : memref<!tpu.dma_semaphore, #tpu.memory_space<semaphore_mem>>)
      } else {
      }
      %124 = arith.index_cast %113 : i32 to index
      %c0_94 = arith.constant 0 : index
      %c0_95 = arith.constant 0 : index
      %125 = vector.load %arg13[%124, %c0_94, %c0_95] : memref<2x1x128xf32, #tpu.memory_space<vmem>>, vector<1x1x128xf32>
      %126 = vector.shape_cast %125 : vector<1x1x128xf32> to vector<1x128xf32>
      %127 = arith.addf %110, %126 : vector<1x128xf32>
      %c5_i32 = arith.constant 5 : i32
      %c8_i32_96 = arith.constant 8 : i32
      %128 = arith.muli %arg15, %c8_i32_96 : i32
      %129 = arith.addi %128, %c5_i32 : i32
      %c1_i32_97 = arith.constant 1 : i32
      %130 = arith.andi %129, %c1_i32_97 : i32
      %c0_i32_98 = arith.constant 0 : i32
      %c0_i32_99 = arith.constant 0 : i32
      %c0_i32_100 = arith.constant 0 : i32
      %131 = tpu.memref_slice %arg2[%c0_i32_98, %c0_i32_99, %c0_i32_100] : memref<64x1x128xf32, #tpu.memory_space<any>> -> memref<1x1x128xf32, #tpu.memory_space<any>>
      %132 = tpu.memref_squeeze %131 : memref<1x1x128xf32, #tpu.memory_space<any>> -> memref<1x128xf32, #tpu.memory_space<any>>
      %c0_i32_101 = arith.constant 0 : i32
      %c0_i32_102 = arith.constant 0 : i32
      %133 = tpu.memref_slice %arg13[%130, %c0_i32_101, %c0_i32_102] : memref<2x1x128xf32, #tpu.memory_space<vmem>> -> memref<1x1x128xf32, #tpu.memory_space<vmem>>
      %134 = tpu.memref_squeeze %133 : memref<1x1x128xf32, #tpu.memory_space<vmem>> -> memref<1x128xf32, #tpu.memory_space<vmem>>
      %135 = tpu.memref_slice %arg14[%130] : memref<2x!tpu.dma_semaphore, #tpu.memory_space<semaphore_mem>> -> memref<1x!tpu.dma_semaphore, #tpu.memory_space<semaphore_mem>>
      %136 = tpu.memref_squeeze %135 : memref<1x!tpu.dma_semaphore, #tpu.memory_space<semaphore_mem>> -> memref<!tpu.dma_semaphore, #tpu.memory_space<semaphore_mem>>
      tpu.wait_dma2 semaphore(%136 : memref<!tpu.dma_semaphore, #tpu.memory_space<semaphore_mem>>) src(%132 : memref<1x128xf32, #tpu.memory_space<any>>) dst(%134 : memref<1x128xf32, #tpu.memory_space<vmem>>)
      %c1_i32_103 = arith.constant 1 : i32
      %137 = arith.addi %129, %c1_i32_103 : i32
      %c128_i32_104 = arith.constant 128 : i32
      %138 = arith.cmpi slt, %137, %c128_i32_104 : i32
      %139 = arith.extui %138 : i1 to i32
      %c0_i32_105 = arith.constant 0 : i32
      %140 = arith.cmpi ne, %139, %c0_i32_105 : i32
      scf.if %140 {
        %c1_i32_134 = arith.constant 1 : i32
        %181 = arith.addi %129, %c1_i32_134 : i32
        %c1_i32_135 = arith.constant 1 : i32
        %182 = arith.subi %c1_i32_135, %130 : i32
        %183 = arith.addi %0, %181 : i32
        %184 = arith.index_cast %183 : i32 to index
        %185 = memref.load %arg1[%184] : memref<128xi32, #tpu.memory_space<smem>>
        %c0_i32_136 = arith.constant 0 : i32
        %c0_i32_137 = arith.constant 0 : i32
        %186 = tpu.memref_slice %arg2[%185, %c0_i32_136, %c0_i32_137] : memref<64x1x128xf32, #tpu.memory_space<any>> -> memref<1x1x128xf32, #tpu.memory_space<any>>
        %187 = tpu.memref_squeeze %186 : memref<1x1x128xf32, #tpu.memory_space<any>> -> memref<1x128xf32, #tpu.memory_space<any>>
        %c0_i32_138 = arith.constant 0 : i32
        %c0_i32_139 = arith.constant 0 : i32
        %188 = tpu.memref_slice %arg13[%182, %c0_i32_138, %c0_i32_139] : memref<2x1x128xf32, #tpu.memory_space<vmem>> -> memref<1x1x128xf32, #tpu.memory_space<vmem>>
        %189 = tpu.memref_squeeze %188 : memref<1x1x128xf32, #tpu.memory_space<vmem>> -> memref<1x128xf32, #tpu.memory_space<vmem>>
        %190 = tpu.memref_slice %arg14[%182] : memref<2x!tpu.dma_semaphore, #tpu.memory_space<semaphore_mem>> -> memref<1x!tpu.dma_semaphore, #tpu.memory_space<semaphore_mem>>
        %191 = tpu.memref_squeeze %190 : memref<1x!tpu.dma_semaphore, #tpu.memory_space<semaphore_mem>> -> memref<!tpu.dma_semaphore, #tpu.memory_space<semaphore_mem>>
        tpu.enqueue_dma source(%187 : memref<1x128xf32, #tpu.memory_space<any>>) target(%189 : memref<1x128xf32, #tpu.memory_space<vmem>>) target_semaphore(%191 : memref<!tpu.dma_semaphore, #tpu.memory_space<semaphore_mem>>)
      } else {
      }
      %141 = arith.index_cast %130 : i32 to index
      %c0_106 = arith.constant 0 : index
      %c0_107 = arith.constant 0 : index
      %142 = vector.load %arg13[%141, %c0_106, %c0_107] : memref<2x1x128xf32, #tpu.memory_space<vmem>>, vector<1x1x128xf32>
      %143 = vector.shape_cast %142 : vector<1x1x128xf32> to vector<1x128xf32>
      %144 = arith.addf %127, %143 : vector<1x128xf32>
      %c6_i32 = arith.constant 6 : i32
      %c8_i32_108 = arith.constant 8 : i32
      %145 = arith.muli %arg15, %c8_i32_108 : i32
      %146 = arith.addi %145, %c6_i32 : i32
      %c1_i32_109 = arith.constant 1 : i32
      %147 = arith.andi %146, %c1_i32_109 : i32
      %c0_i32_110 = arith.constant 0 : i32
      %c0_i32_111 = arith.constant 0 : i32
      %c0_i32_112 = arith.constant 0 : i32
      %148 = tpu.memref_slice %arg2[%c0_i32_110, %c0_i32_111, %c0_i32_112] : memref<64x1x128xf32, #tpu.memory_space<any>> -> memref<1x1x128xf32, #tpu.memory_space<any>>
      %149 = tpu.memref_squeeze %148 : memref<1x1x128xf32, #tpu.memory_space<any>> -> memref<1x128xf32, #tpu.memory_space<any>>
      %c0_i32_113 = arith.constant 0 : i32
      %c0_i32_114 = arith.constant 0 : i32
      %150 = tpu.memref_slice %arg13[%147, %c0_i32_113, %c0_i32_114] : memref<2x1x128xf32, #tpu.memory_space<vmem>> -> memref<1x1x128xf32, #tpu.memory_space<vmem>>
      %151 = tpu.memref_squeeze %150 : memref<1x1x128xf32, #tpu.memory_space<vmem>> -> memref<1x128xf32, #tpu.memory_space<vmem>>
      %152 = tpu.memref_slice %arg14[%147] : memref<2x!tpu.dma_semaphore, #tpu.memory_space<semaphore_mem>> -> memref<1x!tpu.dma_semaphore, #tpu.memory_space<semaphore_mem>>
      %153 = tpu.memref_squeeze %152 : memref<1x!tpu.dma_semaphore, #tpu.memory_space<semaphore_mem>> -> memref<!tpu.dma_semaphore, #tpu.memory_space<semaphore_mem>>
      tpu.wait_dma2 semaphore(%153 : memref<!tpu.dma_semaphore, #tpu.memory_space<semaphore_mem>>) src(%149 : memref<1x128xf32, #tpu.memory_space<any>>) dst(%151 : memref<1x128xf32, #tpu.memory_space<vmem>>)
      %c1_i32_115 = arith.constant 1 : i32
      %154 = arith.addi %146, %c1_i32_115 : i32
      %c128_i32_116 = arith.constant 128 : i32
      %155 = arith.cmpi slt, %154, %c128_i32_116 : i32
      %156 = arith.extui %155 : i1 to i32
      %c0_i32_117 = arith.constant 0 : i32
      %157 = arith.cmpi ne, %156, %c0_i32_117 : i32
      scf.if %157 {
        %c1_i32_134 = arith.constant 1 : i32
        %181 = arith.addi %146, %c1_i32_134 : i32
        %c1_i32_135 = arith.constant 1 : i32
        %182 = arith.subi %c1_i32_135, %147 : i32
        %183 = arith.addi %0, %181 : i32
        %184 = arith.index_cast %183 : i32 to index
        %185 = memref.load %arg1[%184] : memref<128xi32, #tpu.memory_space<smem>>
        %c0_i32_136 = arith.constant 0 : i32
        %c0_i32_137 = arith.constant 0 : i32
        %186 = tpu.memref_slice %arg2[%185, %c0_i32_136, %c0_i32_137] : memref<64x1x128xf32, #tpu.memory_space<any>> -> memref<1x1x128xf32, #tpu.memory_space<any>>
        %187 = tpu.memref_squeeze %186 : memref<1x1x128xf32, #tpu.memory_space<any>> -> memref<1x128xf32, #tpu.memory_space<any>>
        %c0_i32_138 = arith.constant 0 : i32
        %c0_i32_139 = arith.constant 0 : i32
        %188 = tpu.memref_slice %arg13[%182, %c0_i32_138, %c0_i32_139] : memref<2x1x128xf32, #tpu.memory_space<vmem>> -> memref<1x1x128xf32, #tpu.memory_space<vmem>>
        %189 = tpu.memref_squeeze %188 : memref<1x1x128xf32, #tpu.memory_space<vmem>> -> memref<1x128xf32, #tpu.memory_space<vmem>>
        %190 = tpu.memref_slice %arg14[%182] : memref<2x!tpu.dma_semaphore, #tpu.memory_space<semaphore_mem>> -> memref<1x!tpu.dma_semaphore, #tpu.memory_space<semaphore_mem>>
        %191 = tpu.memref_squeeze %190 : memref<1x!tpu.dma_semaphore, #tpu.memory_space<semaphore_mem>> -> memref<!tpu.dma_semaphore, #tpu.memory_space<semaphore_mem>>
        tpu.enqueue_dma source(%187 : memref<1x128xf32, #tpu.memory_space<any>>) target(%189 : memref<1x128xf32, #tpu.memory_space<vmem>>) target_semaphore(%191 : memref<!tpu.dma_semaphore, #tpu.memory_space<semaphore_mem>>)
      } else {
      }
      %158 = arith.index_cast %147 : i32 to index
      %c0_118 = arith.constant 0 : index
      %c0_119 = arith.constant 0 : index
      %159 = vector.load %arg13[%158, %c0_118, %c0_119] : memref<2x1x128xf32, #tpu.memory_space<vmem>>, vector<1x1x128xf32>
      %160 = vector.shape_cast %159 : vector<1x1x128xf32> to vector<1x128xf32>
      %161 = arith.addf %144, %160 : vector<1x128xf32>
      %c7_i32 = arith.constant 7 : i32
      %c8_i32_120 = arith.constant 8 : i32
      %162 = arith.muli %arg15, %c8_i32_120 : i32
      %163 = arith.addi %162, %c7_i32 : i32
      %c1_i32_121 = arith.constant 1 : i32
      %164 = arith.andi %163, %c1_i32_121 : i32
      %c0_i32_122 = arith.constant 0 : i32
      %c0_i32_123 = arith.constant 0 : i32
      %c0_i32_124 = arith.constant 0 : i32
      %165 = tpu.memref_slice %arg2[%c0_i32_122, %c0_i32_123, %c0_i32_124] : memref<64x1x128xf32, #tpu.memory_space<any>> -> memref<1x1x128xf32, #tpu.memory_space<any>>
      %166 = tpu.memref_squeeze %165 : memref<1x1x128xf32, #tpu.memory_space<any>> -> memref<1x128xf32, #tpu.memory_space<any>>
      %c0_i32_125 = arith.constant 0 : i32
      %c0_i32_126 = arith.constant 0 : i32
      %167 = tpu.memref_slice %arg13[%164, %c0_i32_125, %c0_i32_126] : memref<2x1x128xf32, #tpu.memory_space<vmem>> -> memref<1x1x128xf32, #tpu.memory_space<vmem>>
      %168 = tpu.memref_squeeze %167 : memref<1x1x128xf32, #tpu.memory_space<vmem>> -> memref<1x128xf32, #tpu.memory_space<vmem>>
      %169 = tpu.memref_slice %arg14[%164] : memref<2x!tpu.dma_semaphore, #tpu.memory_space<semaphore_mem>> -> memref<1x!tpu.dma_semaphore, #tpu.memory_space<semaphore_mem>>
      %170 = tpu.memref_squeeze %169 : memref<1x!tpu.dma_semaphore, #tpu.memory_space<semaphore_mem>> -> memref<!tpu.dma_semaphore, #tpu.memory_space<semaphore_mem>>
      tpu.wait_dma2 semaphore(%170 : memref<!tpu.dma_semaphore, #tpu.memory_space<semaphore_mem>>) src(%166 : memref<1x128xf32, #tpu.memory_space<any>>) dst(%168 : memref<1x128xf32, #tpu.memory_space<vmem>>)
      %c1_i32_127 = arith.constant 1 : i32
      %171 = arith.addi %163, %c1_i32_127 : i32
      %c128_i32_128 = arith.constant 128 : i32
      %172 = arith.cmpi slt, %171, %c128_i32_128 : i32
      %173 = arith.extui %172 : i1 to i32
      %c0_i32_129 = arith.constant 0 : i32
      %174 = arith.cmpi ne, %173, %c0_i32_129 : i32
      scf.if %174 {
        %c1_i32_134 = arith.constant 1 : i32
        %181 = arith.addi %163, %c1_i32_134 : i32
        %c1_i32_135 = arith.constant 1 : i32
        %182 = arith.subi %c1_i32_135, %164 : i32
        %183 = arith.addi %0, %181 : i32
        %184 = arith.index_cast %183 : i32 to index
        %185 = memref.load %arg1[%184] : memref<128xi32, #tpu.memory_space<smem>>
        %c0_i32_136 = arith.constant 0 : i32
        %c0_i32_137 = arith.constant 0 : i32
        %186 = tpu.memref_slice %arg2[%185, %c0_i32_136, %c0_i32_137] : memref<64x1x128xf32, #tpu.memory_space<any>> -> memref<1x1x128xf32, #tpu.memory_space<any>>
        %187 = tpu.memref_squeeze %186 : memref<1x1x128xf32, #tpu.memory_space<any>> -> memref<1x128xf32, #tpu.memory_space<any>>
        %c0_i32_138 = arith.constant 0 : i32
        %c0_i32_139 = arith.constant 0 : i32
        %188 = tpu.memref_slice %arg13[%182, %c0_i32_138, %c0_i32_139] : memref<2x1x128xf32, #tpu.memory_space<vmem>> -> memref<1x1x128xf32, #tpu.memory_space<vmem>>
        %189 = tpu.memref_squeeze %188 : memref<1x1x128xf32, #tpu.memory_space<vmem>> -> memref<1x128xf32, #tpu.memory_space<vmem>>
        %190 = tpu.memref_slice %arg14[%182] : memref<2x!tpu.dma_semaphore, #tpu.memory_space<semaphore_mem>> -> memref<1x!tpu.dma_semaphore, #tpu.memory_space<semaphore_mem>>
        %191 = tpu.memref_squeeze %190 : memref<1x!tpu.dma_semaphore, #tpu.memory_space<semaphore_mem>> -> memref<!tpu.dma_semaphore, #tpu.memory_space<semaphore_mem>>
        tpu.enqueue_dma source(%187 : memref<1x128xf32, #tpu.memory_space<any>>) target(%189 : memref<1x128xf32, #tpu.memory_space<vmem>>) target_semaphore(%191 : memref<!tpu.dma_semaphore, #tpu.memory_space<semaphore_mem>>)
      } else {
      }
      %175 = arith.index_cast %164 : i32 to index
      %c0_130 = arith.constant 0 : index
      %c0_131 = arith.constant 0 : index
      %176 = vector.load %arg13[%175, %c0_130, %c0_131] : memref<2x1x128xf32, #tpu.memory_space<vmem>>, vector<1x1x128xf32>
      %177 = vector.shape_cast %176 : vector<1x1x128xf32> to vector<1x128xf32>
      %178 = arith.addf %161, %177 : vector<1x128xf32>
      %c8_i32_132 = arith.constant 8 : i32
      %179 = arith.index_cast %arg15 : i32 to index
      %c0_133 = arith.constant 0 : index
      %180 = vector.load %arg12[%179, %c0_133] : memref<16x128xf32, #tpu.memory_space<vmem>>, vector<1x128xf32>
      tpu.vector_store %arg12[%179, %c0_133], %178 {strides = array<i32>} : memref<16x128xf32, #tpu.memory_space<vmem>>, vector<1x128xf32>,
    }
    %c16_i32_7 = arith.constant 16 : i32
    %c0 = arith.constant 0 : index
    %c0_8 = arith.constant 0 : index
    %11 = vector.load %arg12[%c0, %c0_8] : memref<16x128xf32, #tpu.memory_space<vmem>>, vector<16x128xf32>
    %12 = vector.extract_strided_slice %11 {offsets = [0, 0], sizes = [8, 128], strides = [1, 1]} : vector<16x128xf32> to vector<8x128xf32>
    %13 = vector.extract_strided_slice %11 {offsets = [8, 0], sizes = [8, 128], strides = [1, 1]} : vector<16x128xf32> to vector<8x128xf32>
    %c0_9 = arith.constant 0 : index
    %c0_10 = arith.constant 0 : index
    %14 = vector.load %arg3[%c0_9, %c0_10] : memref<128x128xf32, #tpu.memory_space<vmem>>, vector<128x128xf32>
    %cst = arith.constant dense<0.000000e+00> : vector<8x128xf32>
    %15 = tpu.matmul %12, %14, %cst {dimension_numbers = #tpu.dot_dimension_numbers<[1], [0], [0], [1], [0, 0, 1, 1], [], []>} : vector<8x128xf32>, vector<128x128xf32>, vector<8x128xf32> -> vector<8x128xf32>
    %c0_11 = arith.constant 0 : index
    %c0_12 = arith.constant 0 : index
    %16 = vector.load %arg4[%c0_11, %c0_12] : memref<128x128xf32, #tpu.memory_space<vmem>>, vector<128x128xf32>
    %cst_13 = arith.constant dense<0.000000e+00> : vector<8x128xf32>
    %17 = tpu.matmul %13, %16, %cst_13 {dimension_numbers = #tpu.dot_dimension_numbers<[1], [0], [0], [1], [0, 0, 1, 1], [], []>} : vector<8x128xf32>, vector<128x128xf32>, vector<8x128xf32> -> vector<8x128xf32>
    %18 = arith.addf %15, %17 : vector<8x128xf32>
    %cst_14 = arith.constant 0.000000e+00 : f32
    %19 = vector.broadcast %cst_14 : f32 to vector<8x128xf32>
    %20 = arith.maximumf %18, %19 : vector<8x128xf32>
    %c0_15 = arith.constant 0 : index
    %c0_16 = arith.constant 0 : index
    %21 = vector.load %arg5[%c0_15, %c0_16] : memref<128x128xf32, #tpu.memory_space<vmem>>, vector<128x128xf32>
    %cst_17 = arith.constant dense<0.000000e+00> : vector<8x128xf32>
    %22 = tpu.matmul %20, %21, %cst_17 {dimension_numbers = #tpu.dot_dimension_numbers<[1], [0], [0], [1], [0, 0, 1, 1], [], []>} : vector<8x128xf32>, vector<128x128xf32>, vector<8x128xf32> -> vector<8x128xf32>
    %c0_18 = arith.constant 0 : index
    %c0_19 = arith.constant 0 : index
    %23 = vector.load %arg8[%c0_18, %c0_19] : memref<1x128xf32, #tpu.memory_space<vmem>>, vector<1x128xf32>
    %24 = vector.broadcast %23 : vector<1x128xf32> to vector<8x128xf32>
    %25 = arith.addf %22, %24 : vector<8x128xf32>
    %cst_20 = arith.constant 0.000000e+00 : f32
    %26 = vector.broadcast %cst_20 : f32 to vector<8x128xf32>
    %27 = arith.maximumf %25, %26 : vector<8x128xf32>
    %c0_21 = arith.constant 0 : index
    %c0_22 = arith.constant 0 : index
    %28 = vector.load %arg6[%c0_21, %c0_22] : memref<128x128xf32, #tpu.memory_space<vmem>>, vector<128x128xf32>
    %cst_23 = arith.constant dense<0.000000e+00> : vector<8x128xf32>
    %29 = tpu.matmul %27, %28, %cst_23 {dimension_numbers = #tpu.dot_dimension_numbers<[1], [0], [0], [1], [0, 0, 1, 1], [], []>} : vector<8x128xf32>, vector<128x128xf32>, vector<8x128xf32> -> vector<8x128xf32>
    %c0_24 = arith.constant 0 : index
    %c0_25 = arith.constant 0 : index
    %30 = vector.load %arg9[%c0_24, %c0_25] : memref<1x128xf32, #tpu.memory_space<vmem>>, vector<1x128xf32>
    %31 = vector.broadcast %30 : vector<1x128xf32> to vector<8x128xf32>
    %32 = arith.addf %29, %31 : vector<8x128xf32>
    %cst_26 = arith.constant 0.000000e+00 : f32
    %33 = vector.broadcast %cst_26 : f32 to vector<8x128xf32>
    %34 = arith.maximumf %32, %33 : vector<8x128xf32>
    %c0_27 = arith.constant 0 : index
    %c0_28 = arith.constant 0 : index
    %35 = vector.load %arg7[%c0_27, %c0_28] : memref<128x128xf32, #tpu.memory_space<vmem>>, vector<128x128xf32>
    %cst_29 = arith.constant dense<0.000000e+00> : vector<8x128xf32>
    %36 = tpu.matmul %34, %35, %cst_29 {dimension_numbers = #tpu.dot_dimension_numbers<[1], [0], [0], [1], [0, 0, 1, 1], [], []>} : vector<8x128xf32>, vector<128x128xf32>, vector<8x128xf32> -> vector<8x128xf32>
    %c0_30 = arith.constant 0 : index
    %c0_31 = arith.constant 0 : index
    %37 = vector.load %arg10[%c0_30, %c0_31] : memref<1x128xf32, #tpu.memory_space<vmem>>, vector<1x128xf32>
    %38 = vector.broadcast %37 : vector<1x128xf32> to vector<8x128xf32>
    %39 = arith.addf %36, %38 : vector<8x128xf32>
    %40 = math.tanh %39 : vector<8x128xf32>
    %c0_32 = arith.constant 0 : index
    %c0_33 = arith.constant 0 : index
    %41 = vector.load %arg11[%c0_32, %c0_33] : memref<8x128xf32, #tpu.memory_space<vmem>>, vector<8x128xf32>
    tpu.vector_store %arg11[%c0_32, %c0_33], %40 {strides = array<i32>} : memref<8x128xf32, #tpu.memory_space<vmem>>, vector<8x128xf32>,
    return
  }
  func.func @transform_1(%arg0: i32, %arg1: memref<128xi32, #tpu.memory_space<smem>>) -> (i32, i32) {
    %c0_i32 = arith.constant 0 : i32
    %c0_i32_0 = arith.constant 0 : i32
    %c0_i32_1 = arith.constant 0 : i32
    return %c0_i32, %c0_i32_0 : i32, i32
  }
  func.func @transform_2(%arg0: i32, %arg1: memref<128xi32, #tpu.memory_space<smem>>) -> (i32, i32) {
    %c0_i32 = arith.constant 0 : i32
    %c0_i32_0 = arith.constant 0 : i32
    %c0_i32_1 = arith.constant 0 : i32
    return %c0_i32, %c0_i32_0 : i32, i32
  }
  func.func @transform_3(%arg0: i32, %arg1: memref<128xi32, #tpu.memory_space<smem>>) -> (i32, i32) {
    %c0_i32 = arith.constant 0 : i32
    %c0_i32_0 = arith.constant 0 : i32
    %c0_i32_1 = arith.constant 0 : i32
    return %c0_i32, %c0_i32_0 : i32, i32
  }
  func.func @transform_4(%arg0: i32, %arg1: memref<128xi32, #tpu.memory_space<smem>>) -> (i32, i32) {
    %c0_i32 = arith.constant 0 : i32
    %c0_i32_0 = arith.constant 0 : i32
    %c0_i32_1 = arith.constant 0 : i32
    return %c0_i32, %c0_i32_0 : i32, i32
  }
  func.func @transform_5(%arg0: i32, %arg1: memref<128xi32, #tpu.memory_space<smem>>) -> (i32, i32) {
    %c0_i32 = arith.constant 0 : i32
    %c0_i32_0 = arith.constant 0 : i32
    %c0_i32_1 = arith.constant 0 : i32
    return %c0_i32, %c0_i32_0 : i32, i32
  }
  func.func @transform_6(%arg0: i32, %arg1: memref<128xi32, #tpu.memory_space<smem>>) -> (i32, i32) {
    %c0_i32 = arith.constant 0 : i32
    %c0_i32_0 = arith.constant 0 : i32
    %c0_i32_1 = arith.constant 0 : i32
    return %c0_i32, %c0_i32_0 : i32, i32
  }
  func.func @transform_7(%arg0: i32, %arg1: memref<128xi32, #tpu.memory_space<smem>>) -> (i32, i32) {
    %c0_i32 = arith.constant 0 : i32
    %c0_i32_0 = arith.constant 0 : i32
    %c0_i32_1 = arith.constant 0 : i32
    return %c0_i32, %c0_i32_0 : i32, i32
  }
  func.func @transform_8(%arg0: i32, %arg1: memref<128xi32, #tpu.memory_space<smem>>) -> (i32, i32) {
    %c0_i32 = arith.constant 0 : i32
    %c0_i32_0 = arith.constant 0 : i32
    %c0_i32_1 = arith.constant 0 : i32
    return %c0_i32, %c0_i32_0 : i32, i32
  }
  func.func @transform_9(%arg0: i32, %arg1: memref<128xi32, #tpu.memory_space<smem>>) -> (i32, i32) {
    %c0_i32 = arith.constant 0 : i32
    %c0_i32_0 = arith.constant 0 : i32
    return %arg0, %c0_i32 : i32, i32
  }
}

</mosaic_0001>

<bundles_post_ra>
// kernel: tpu_custom_call.1
= control target key start
LH: loop header
LB: loop body
LE: loop exit
PB: predicated region body
PF: predicated region fallthrough
CT: control target
= control target key end

     0   :  { %s2336_s0 = inlined_call_operand.hbm [shape: s32[128], index: 0, kind: input, shape index: {}]   ;;  %s2337_s1 = inlined_call_operand.hbm [shape: f32[64,1,128], index: 1, kind: input, shape index: {}]   ;;  %s2338_s2 = inlined_call_operand.hbm [shape: f32[128,128], index: 2, kind: input, shape index: {}]   ;;  %s2339_s3 = inlined_call_operand.hbm [shape: f32[128,128], index: 3, kind: input, shape index: {}]   ;;  %s2340_s4 = inlined_call_operand.hbm [shape: f32[128,128], index: 4, kind: input, shape index: {}]   ;;  %s2341_s5 = inlined_call_operand.hbm [shape: f32[128,128], index: 5, kind: input, shape index: {}]   ;;  %s2342_s6 = inlined_call_operand.hbm [shape: f32[128,128], index: 6, kind: input, shape index: {}]   ;;  %s2343_s7 = inlined_call_operand.vmem [shape: f32[1,128], index: 7, kind: input, shape index: {}]   ;;  %s2344_s8 = inlined_call_operand.vmem [shape: f32[1,128], index: 8, kind: input, shape index: {}]   ;;  %s2345_s9 = inlined_call_operand.vmem [shape: f32[1,128], index: 9, kind: input, shape index: {}]   ;;  %s2346_s10 = inlined_call_operand.hbm [shape: f32[8,128], index: 10, kind: output, shape index: {}]  }
   0x1   :  { %s1381_s15 = scalar_lea.hbm %s2336_s0, 16 }
   0x2   :  { %p1382_p0 = scmp.ne.s32.totalorder %s2336_s0, %s1381_s15  ;;  %p1385_p1 = scmp.lt.u32.totalorder %s1381_s15, %s2336_s0 }
   0x4   :  { %p1387_p2 = pnand %p1385_p1, %p1382_p0 }
   0x6   :  { %1390 = shalt.err (!%p1387_p2)  }
   0x7   :  { %s1805_s20 = smov [#allocation6]  }
   0x8   :  { %16 = dma.hbm_to_smem %s2336_s0, 16, %s1805_s20, [#allocation5] }
   0x9   :  { %1775 = dma.done.wait [#allocation5], 16 }
   0xa   :  { %1776 = vsyncadd [#allocation5], 4294967280 }
   0xb   :  { %18 = sfence }
   0xc   :  { %19 = vsyncpa [#allocation8], 0 }
   0xd   :  { %20 = vsyncpa [#allocation11], 0 }
   0xe   :  { %21 = vsyncpa [#allocation14], 0 }
   0xf   :  { %22 = vsyncpa [#allocation9], 0  ;;  %s1806_s23 = smov [#allocation10]   ;;  %s1807_s25 = smov [#allocation13]  }
  0x10   :  { %s40_s24 = sshll.u32 %s1806_s23, 4  ;;  %s64_s26 = sshll.u32 %s1807_s25, 4  ;;  %s41_s24 = int_to_ptr.vmem [resolvable:$true] %s40_s24  ;;  %s1885_s26 = int_to_ptr.vmem [resolvable:$true] %s64_s26 }
  0x11   :  { %s1391_s29 = scalar_lea.hbm %s2339_s3, 2048 }
  0x12   :  { %p1392_p3 = scmp.ne.s32.totalorder %s2339_s3, %s1391_s29  ;;  %p1395_p4 = scmp.lt.u32.totalorder %s1391_s29, %s2339_s3 }
  0x14   :  { %p1397_p5 = pnand %p1395_p4, %p1392_p3 }
  0x16   :  { %1400 = shalt.err (!%p1397_p5)
}
  0x17   :  { %s1401_s13 = scalar_lea.vmem %s41_s24, 2048  ;;  %p1406_p7 = scmp.lt.s32.totalorder %s41_s24, %s41_s24 }
  0x18   :  { %p1402_p6 = scmp.ne.s32.totalorder %s41_s24, %s1401_s13  ;;  %p1407_p8 = scmp.lt.s32.totalorder %s1401_s13, %s1401_s13 }
  0x1a   :  { %p1408_p9 = por %p1407_p8, %p1406_p7 }
  0x1c   :  { %p1409_p10 = pnand %p1408_p9, %p1402_p6 }
  0x1e   :  { %1412 = shalt.err (!%p1409_p10)
}
  0x1f   :  { %s1808_s14 = smov 128   ;;  %s1809_s15 = smov 8  }
  0x20   :  { %46 = dma.hbm_to_vmem [thread:$0]  %s2339_s3, 2048, %s41_s24, [#allocation11], %s1808_s14, %s1808_s14, %s1809_s15  }
  0x21   :  { %s1413_s20 = scalar_lea.hbm %s2341_s5, 2048 }
  0x22   :  { %p1414_p11 = scmp.ne.s32.totalorder %s2341_s5, %s1413_s20  ;;  %p1417_p12 = scmp.lt.u32.totalorder %s1413_s20, %s2341_s5 }
  0x24   :  { %p1419_p13 = pnand %p1417_p12, %p1414_p11 }
  0x26   :  { %1422 = shalt.err (!%p1419_p13)
}
  0x27   :  { %s1423_s27 = scalar_lea.vmem %s1885_s26, 2048  ;;  %p1428_p1 = scmp.lt.s32.totalorder %s1885_s26, %s1885_s26 }
  0x28   :  { %p1424_p0 = scmp.ne.s32.totalorder %s1885_s26, %s1423_s27  ;;  %p1429_p2 = scmp.lt.s32.totalorder %s1423_s27, %s1423_s27 }
  0x2a   :  { %p1430_p3 = por %p1429_p2, %p1428_p1 }
  0x2c   :  { %p1431_p4 = pnand %p1430_p3, %p1424_p0 }
  0x2e   :  { %1434 = shalt.err (!%p1431_p4)
}
  0x2f   :  { %70 = dma.hbm_to_vmem [thread:$0]  %s2341_s5, 2048, %s1885_s26, [#allocation14], %s1808_s14, %s1808_s14, %s1809_s15  }
  0x30   :  { %s1810_s28 = smov [#allocation7]   ;;  %s1811_s30 = smov [#allocation12]  }
  0x31   :  { %s28_s29 = sshll.u32 %s1810_s28, 4  ;;  %s52_s0 = sshll.u32 %s1811_s30, 4  ;;  %s29_s29 = int_to_ptr.vmem [resolvable:$true] %s28_s29  ;;  %s1922_s0 = int_to_ptr.vmem [resolvable:$true] %s52_s0 }
  0x32   :  { %s1435_s13 = scalar_lea.hbm %s2338_s2, 2048 }
  0x33   :  { %p1436_p5 = scmp.ne.s32.totalorder %s2338_s2, %s1435_s13  ;;  %p1439_p6 = scmp.lt.u32.totalorder %s1435_s13, %s2338_s2 }
  0x35   :  { %p1441_p7 = pnand %p1439_p6, %p1436_p5 }
  0x37   :  { %1444 = shalt.err (!%p1441_p7)
}
  0x38   :  { %s1445_s5 = scalar_lea.vmem %s29_s29, 2048  ;;  %p1450_p9 = scmp.lt.s32.totalorder %s29_s29, %s29_s29 }
  0x39   :  { %p1446_p8 = scmp.ne.s32.totalorder %s29_s29, %s1445_s5  ;;  %p1451_p10 = scmp.lt.s32.totalorder %s1445_s5, %s1445_s5 }
  0x3b   :  { %p1452_p11 = por %p1451_p10, %p1450_p9 }
  0x3d   :  { %p1453_p12 = pnand %p1452_p11, %p1446_p8 }
  0x3f   :  { %1456 = shalt.err (!%p1453_p12)
}
  0x40   :  { %34 = dma.hbm_to_vmem [thread:$0]  %s2338_s2, 2048, %s29_s29, [#allocation8], %s1808_s14, %s1808_s14, %s1809_s15  }
  0x41   :  { %s1457_s23 = scalar_lea.hbm %s2340_s4, 2048 }
  0x42   :  { %p1458_p13 = scmp.ne.s32.totalorder %s2340_s4, %s1457_s23  ;;  %p1461_p0 = scmp.lt.u32.totalorder %s1457_s23, %s2340_s4 }
  0x44   :  { %p1463_p1 = pnand %p1461_p0, %p1458_p13 }
  0x46   :  { %1466 = shalt.err (!%p1463_p1)
}
  0x47   :  { %s1467_s28 = scalar_lea.vmem %s1922_s0, 2048  ;;  %p1472_p3 = scmp.lt.s32.totalorder %s1922_s0, %s1922_s0 }
  0x48   :  { %p1468_p2 = scmp.ne.s32.totalorder %s1922_s0, %s1467_s28  ;;  %p1473_p4 = scmp.lt.s32.totalorder %s1467_s28, %s1467_s28 }
  0x4a   :  { %p1474_p5 = por %p1473_p4, %p1472_p3 }
  0x4c   :  { %p1475_p6 = pnand %p1474_p5, %p1468_p2 }
  0x4e   :  { %1478 = shalt.err (!%p1475_p6)
}
  0x4f   :  { %58 = dma.hbm_to_vmem [thread:$0]  %s2340_s4, 2048, %s1922_s0, [#allocation11], %s1808_s14, %s1808_s14, %s1809_s15  }
  0x50   :  { %s1812_s30 = smov [#allocation15]   ;;  %s1479_s16 = scalar_lea.hbm %s2342_s6, 2048 }
  0x51   :  { %s76_s11 = sshll.u32 %s1812_s30, 4  ;;  %p1480_p7 = scmp.ne.s32.totalorder %s2342_s6, %s1479_s16  ;;  %s77_s11 = int_to_ptr.vmem [resolvable:$true] %s76_s11 }
  0x52   :  { %p1483_p8 = scmp.lt.u32.totalorder %s1479_s16, %s2342_s6 }
  0x54   :  { %p1485_p9 = pnand %p1483_p8, %p1480_p7 }
  0x56   :  { %1488 = shalt.err (!%p1485_p9)
}
  0x57   :  { %s1489_s26 = scalar_lea.vmem %s77_s11, 2048  ;;  %p1494_p11 = scmp.lt.s32.totalorder %s77_s11, %s77_s11 }
  0x58   :  { %p1490_p10 = scmp.ne.s32.totalorder %s77_s11, %s1489_s26  ;;  %p1495_p12 = scmp.lt.s32.totalorder %s1489_s26, %s1489_s26 }
  0x5a   :  { %p1496_p13 = por %p1495_p12, %p1494_p11 }
  0x5c   :  { %p1497_p0 = pnand %p1496_p13, %p1490_p10 }
  0x5e   :  { %1500 = shalt.err (!%p1497_p0)
}
  0x5f   :  { %82 = dma.hbm_to_vmem [thread:$0]  %s2342_s6, 2048, %s77_s11, [#allocation14], %s1808_s14, %s1808_s14, %s1809_s15  }
  0x60   :  { %1777 = dma.done.wait [#allocation8], 2048  }
  0x61   :  { %1778 = vsyncadd [#allocation8], 4294965248 }
  0x62   :  { %1779 = dma.done.wait [#allocation11], 4096  }
  0x63   :  { %1780 = vsyncadd [#allocation11], 4294963200 }
  0x64   :  { %1781 = dma.done.wait [#allocation14], 4096  }
  0x65   :  { %1782 = vsyncadd [#allocation14], 4294963200  ;;  %s105_s20 = sld [smem:[#allocation6]]  ;;  %s1813_s21 = smov [#allocation3]  }
  0x66   :  { %s115_s22 = sshll.u32 %s1813_s21, 4  ;;  %s1982_s14 = scalar_lea.hbm %s2337_s1, 1024  ;;  %s1974_s22 = int_to_ptr.vmem [resolvable:$true] %s115_s22 }
  0x6b   :  { %s913_s23 = sshll.u32 %s105_s20, 4 }
  0x6c   :  { %s107_s3 = scalar_lea.hbm %s2337_s1, %s913_s23 }
  0x6d   :  { %s1501_s24 = scalar_lea.hbm %s107_s3, 16  ;;  %p1504_p2 = scmp.lt.u32.totalorder %s107_s3, %s2337_s1 }
  0x6e   :  { %p1502_p1 = scmp.ne.s32.totalorder %s107_s3, %s1501_s24  ;;  %p1505_p3 = scmp.lt.u32.totalorder %s1982_s14, %s1501_s24 }
  0x6f   :  { %p1507_p5 = scmp.lt.u32.totalorder %s1501_s24, %s107_s3 }
  0x70   :  { %p1506_p4 = por %p1505_p3, %p1504_p2 }
  0x72   :  { %p1508_p6 = por %p1507_p5, %p1506_p4 }
  0x74   :  { %p1509_p7 = pnand %p1508_p6, %p1502_p1 }
  0x76   :  { %1512 = shalt.err (!%p1509_p7)  }
  0x77   :  { %s1513_s29 = scalar_lea.vmem %s1974_s22, 16  ;;  %s1991_s30 = scalar_lea.vmem %s1974_s22, 32 }
  0x78   :  { %p1514_p8 = scmp.ne.s32.totalorder %s1974_s22, %s1513_s29  ;;  %p1518_p9 = scmp.lt.s32.totalorder %s1974_s22, %s1974_s22 }
  0x79   :  { %p1519_p10 = scmp.lt.s32.totalorder %s1991_s30, %s1513_s29 }
  0x7b   :  { %p1520_p11 = por %p1519_p10, %p1518_p9 }
  0x7d   :  { %p1521_p12 = pnand %p1520_p11, %p1514_p8 }
  0x7f   :  { %1524 = shalt.err (!%p1521_p12)  }
  0x80   :  { %118 = dma.hbm_to_vmem [thread:$0]  %s107_s3, 16, %s1974_s22, [#allocation4] }
  0x81   :  { %s1997_s11 = smov 0  }
  0x82 LB: > { %s2003_s12 = sshll.u32 %s1803_s11, 3  ;;  %s1803_s11 = sphi %s1997_s11, %s124_s11  }
  0x83   : > { %s2006_s13 = sand.u32 1, %s2003_s12 }
  0x84   : > { %s127_s16 = scalar_lea.vmem [#allocation3], %s2006_s13  ;;  %s128_s17 = scalar_lea.sflag [#allocation4], %s2006_s13 }
  0x85   : > { %1783 = dma.done.wait %s128_s17, 16 }
  0x86   : > { %1784 = vsyncadd %s128_s17, 4294967280  ;;  %s2011_s18 = sadd.s32 1, %s2003_s12  ;;  %s137_s19 = ssub.s32 1, %s2006_s13 }
  0x87   : > { %p1350_p13 = scmp.lt.s32.totalorder %s2011_s18, 128  ;;  %s2016_s5 = sand.u32 1, %s2011_s18 }
  0x88   : > { %s142_s20 = scalar_lea.vmem [#allocation3], %s137_s19  ;;  %s143_s24 = scalar_lea.sflag [#allocation4], %s137_s19 }
  0x89   : > { %s1319_s26 = scalar_select %p1350_p13, [#allocation6], [#allocation37] }
  0x8a   : > { %s1320_s4 = scalar_select %p1350_p13, %s2011_s18, 0 }
  0x8b   : > { %s151_s21 = sshll.u32 %s142_s20, 4  ;;  %s152_s21 = int_to_ptr.vmem [resolvable:$true] %s151_s21 }
  0x8c   : > { %s139_s0 = sld [smem:[%s1319_s26 + %s1320_s4]] }
  0x92   : > { %s916_s23 = sshll.u32 %s139_s0, 4 }
  0x93   : > { %s141_s3 = scalar_lea.hbm %s2337_s1, %s916_s23 }
  0x94   : > { %s1525_s28 = scalar_lea.hbm %s141_s3, 16  ;;  %p1530_p3 = scmp.lt.u32.totalorder %s141_s3, %s2337_s1 }
  0x95   : > { %p1526_p0 = scmp.ne.s32.totalorder %s141_s3, %s1525_s28  ;;  %p1531_p4 = scmp.lt.u32.totalorder %s1982_s14, %s1525_s28 }
  0x96   : > { %p1533_p6 = scmp.lt.u32.totalorder %s1525_s28, %s141_s3 }
  0x97   : > { %p1527_p1 = pnand %p1526_p0, %p1350_p13  ;;  %p1532_p5 = por %p1531_p4, %p1530_p3 }
  0x99   : > { %p1528_p2 = pneg %p1527_p1  ;;  %p1534_p7 = por %p1533_p6, %p1532_p5 }
  0x9b   : > { %p1535_p8 = pnand %p1534_p7, %p1528_p2 }
  0x9d   : > { %1538 = shalt.err (!%p1535_p8)  }
  0x9e   : > { %s1539_s2 = scalar_lea.vmem %s152_s21, 16  ;;  %p1546_p12 = scmp.lt.s32.totalorder %s152_s21, %s1974_s22 }
  0x9f   : > { %p1540_p9 = scmp.ne.s32.totalorder %s152_s21, %s1539_s2  ;;  %p1547_p0 = scmp.lt.s32.totalorder %s1991_s30, %s1539_s2 }
  0xa1   : > { %p1541_p10 = pnand %p1540_p9, %p1350_p13  ;;  %p1548_p1 = por %p1547_p0, %p1546_p12 }
  0xa3   : > { %p1542_p11 = pneg %p1541_p10 }
  0xa5   : > { %p1549_p3 = pnand %p1548_p1, %p1542_p11 }
  0xa7   : > { %1552 = shalt.err (!%p1549_p3)  }
  0xa8   : > { %1321 = dma.hbm_to_vmem [thread:$0]  (%p1350_p13), %s141_s3, 16, %s152_s21, %s143_s24 }
  0xa9   : > { %v155_v0 = vld [vmem:[%s127_s16] sm:$0x1]  ;;  %s158_s29 = scalar_lea.vmem [#allocation3], %s2016_s5  ;;  %s159_s17 = scalar_lea.sflag [#allocation4], %s2016_s5 }
  0xaa   : > { %1785 = dma.done.wait %s159_s17, 16 }
  0xab   : > { %1786 = vsyncadd %s159_s17, 4294967280  ;;  %s2043_s19 = sadd.s32 2, %s2003_s12  ;;  %s167_s18 = ssub.s32 1, %s2016_s5 }
  0xac   : > { %p1351_p2 = scmp.lt.s32.totalorder %s2043_s19, 128  ;;  %s2048_s26 = sand.u32 1, %s2043_s19 }
  0xad   : > { %s172_s0 = scalar_lea.vmem [#allocation3], %s167_s18  ;;  %s173_s3 = scalar_lea.sflag [#allocation4], %s167_s18 }
  0xae   : > { %s1323_s13 = scalar_select %p1351_p2, [#allocation6], [#allocation38] }
  0xaf   : > { %s1324_s16 = scalar_select %p1351_p2, %s2043_s19, 0 }
  0xb0   : > { %s181_s20 = sshll.u32 %s172_s0, 4  ;;  %s182_s20 = int_to_ptr.vmem [resolvable:$true] %s181_s20 }
  0xb1   : > { %s169_s4 = sld [smem:[%s1323_s13 + %s1324_s16]] }
  0xb7   : > { %s918_s21 = sshll.u32 %s169_s4, 4 }
  0xb8   : > { %s171_s27 = scalar_lea.hbm %s2337_s1, %s918_s21 }
  0xb9   : > { %s1553_s24 = scalar_lea.hbm %s171_s27, 16  ;;  %p1558_p6 = scmp.lt.u32.totalorder %s171_s27, %s2337_s1 }
  0xba   : > { %p1554_p13 = scmp.ne.s32.totalorder %s171_s27, %s1553_s24  ;;  %p1559_p7 = scmp.lt.u32.totalorder %s1982_s14, %s1553_s24 }
  0xbb   : > { %p1561_p9 = scmp.lt.u32.totalorder %s1553_s24, %s171_s27 }
  0xbc   : > { %p1555_p4 = pnand %p1554_p13, %p1351_p2  ;;  %p1560_p8 = por %p1559_p7, %p1558_p6 }
  0xbe   : > { %p1556_p5 = pneg %p1555_p4  ;;  %p1562_p10 = por %p1561_p9, %p1560_p8 }
  0xc0   : > { %p1563_p11 = pnand %p1562_p10, %p1556_p5 }
  0xc2   : > { %1566 = shalt.err (!%p1563_p11)  }
  0xc3   : > { %s1567_s15 = scalar_lea.vmem %s182_s20, 16  ;;  %p1574_p3 = scmp.lt.s32.totalorder %s182_s20, %s1974_s22 }
  0xc4   : > { %p1568_p12 = scmp.ne.s32.totalorder %s182_s20, %s1567_s15  ;;  %p1575_p13 = scmp.lt.s32.totalorder %s1991_s30, %s1567_s15 }
  0xc6   : > { %p1569_p0 = pnand %p1568_p12, %p1351_p2  ;;  %p1576_p4 = por %p1575_p13, %p1574_p3 }
  0xc8   : > { %p1570_p1 = pneg %p1569_p0 }
  0xca   : > { %p1577_p6 = pnand %p1576_p4, %p1570_p1 }
  0xcc   : > { %1580 = shalt.err (!%p1577_p6)  }
  0xcd   : > { %1325 = dma.hbm_to_vmem [thread:$0]  (%p1351_p2), %s171_s27, 16, %s182_s20, %s173_s3 }
  0xce   : > { %v185_v1 = vld [vmem:[%s158_s29] sm:$0x1]  ;;  %s188_s2 = scalar_lea.vmem [#allocation3], %s2048_s26  ;;  %s189_s17 = scalar_lea.sflag [#allocation4], %s2048_s26 }
  0xcf   : > { %v186_v2 = vadd.f32 %v185_v1, %v155_v0 }
  0xd0   : > { %1787 = dma.done.wait %s189_s17, 16 }
  0xd1   : > { %1788 = vsyncadd %s189_s17, 4294967280  ;;  %s2075_s18 = sadd.s32 3, %s2003_s12  ;;  %s197_s19 = ssub.s32 1, %s2048_s26 }
  0xd2   : > { %p1352_p5 = scmp.lt.s32.totalorder %s2075_s18, 128  ;;  %s2080_s5 = sand.u32 1, %s2075_s18 }
  0xd3   : > { %s202_s4 = scalar_lea.vmem [#allocation3], %s197_s19  ;;  %s203_s27 = scalar_lea.sflag [#allocation4], %s197_s19 }
  0xd4   : > { %s1327_s29 = scalar_select %p1352_p5, [#allocation6], [#allocation39] }
  0xd5   : > { %s1328_s13 = scalar_select %p1352_p5, %s2075_s18, 0 }
  0xd6   : > { %s211_s0 = sshll.u32 %s202_s4, 4  ;;  %s212_s0 = int_to_ptr.vmem [resolvable:$true] %s211_s0 }
  0xd7   : > { %s199_s16 = sld [smem:[%s1327_s29 + %s1328_s13]] }
  0xdd   : > { %s920_s20 = sshll.u32 %s199_s16, 4 }
  0xde   : > { %s201_s25 = scalar_lea.hbm %s2337_s1, %s920_s20 }
  0xdf   : > { %s1581_s3 = scalar_lea.hbm %s201_s25, 16  ;;  %p1586_p9 = scmp.lt.u32.totalorder %s201_s25, %s2337_s1 }
  0xe0   : > { %p1582_p2 = scmp.ne.s32.totalorder %s201_s25, %s1581_s3  ;;  %p1587_p10 = scmp.lt.u32.totalorder %s1982_s14, %s1581_s3 }
  0xe1   : > { %p1589_p12 = scmp.lt.u32.totalorder %s1581_s3, %s201_s25 }
  0xe2   : > { %p1583_p7 = pnand %p1582_p2, %p1352_p5  ;;  %p1588_p11 = por %p1587_p10, %p1586_p9 }
  0xe4   : > { %p1584_p8 = pneg %p1583_p7  ;;  %p1590_p0 = por %p1589_p12, %p1588_p11 }
  0xe6   : > { %p1591_p1 = pnand %p1590_p0, %p1584_p8 }
  0xe8   : > { %1594 = shalt.err (!%p1591_p1)  }
  0xe9   : > { %s1595_s6 = scalar_lea.vmem %s212_s0, 16  ;;  %p1602_p6 = scmp.lt.s32.totalorder %s212_s0, %s1974_s22 }
  0xea   : > { %p1596_p3 = scmp.ne.s32.totalorder %s212_s0, %s1595_s6  ;;  %p1603_p2 = scmp.lt.s32.totalorder %s1991_s30, %s1595_s6 }
  0xec   : > { %p1597_p13 = pnand %p1596_p3, %p1352_p5  ;;  %p1604_p7 = por %p1603_p2, %p1602_p6 }
  0xee   : > { %p1598_p4 = pneg %p1597_p13 }
  0xf0   : > { %p1605_p9 = pnand %p1604_p7, %p1598_p4 }
  0xf2   : > { %1608 = shalt.err (!%p1605_p9)  }
  0xf3   : > { %1329 = dma.hbm_to_vmem [thread:$0]  (%p1352_p5), %s201_s25, 16, %s212_s0, %s203_s27 }
  0xf4   : > { %v215_v3 = vld [vmem:[%s188_s2] sm:$0x1]  ;;  %s218_s15 = scalar_lea.vmem [#allocation3], %s2080_s5  ;;  %s219_s17 = scalar_lea.sflag [#allocation4], %s2080_s5 }
  0xf5   : > { %v216_v4 = vadd.f32 %v215_v3, %v186_v2 }
  0xf6   : > { %1789 = dma.done.wait %s219_s17, 16 }
  0xf7   : > { %1790 = vsyncadd %s219_s17, 4294967280  ;;  %s2107_s19 = sadd.s32 4, %s2003_s12  ;;  %s227_s18 = ssub.s32 1, %s2080_s5 }
  0xf8   : > { %p1353_p8 = scmp.lt.s32.totalorder %s2107_s19, 128  ;;  %s2112_s26 = sand.u32 1, %s2107_s19 }
  0xf9   : > { %s232_s16 = scalar_lea.vmem [#allocation3], %s227_s18  ;;  %s233_s25 = scalar_lea.sflag [#allocation4], %s227_s18 }
  0xfa   : > { %s1331_s2 = scalar_select %p1353_p8, [#allocation6], [#allocation40] }
  0xfb   : > { %s1332_s29 = scalar_select %p1353_p8, %s2107_s19, 0 }
  0xfc   : > { %s241_s4 = sshll.u32 %s232_s16, 4  ;;  %s242_s4 = int_to_ptr.vmem [resolvable:$true] %s241_s4 }
  0xfd   : > { %s229_s13 = sld [smem:[%s1331_s2 + %s1332_s29]] }
 0x103   : > { %s922_s0 = sshll.u32 %s229_s13, 4 }
 0x104   : > { %s231_s23 = scalar_lea.hbm %s2337_s1, %s922_s0 }
 0x105   : > { %s1609_s27 = scalar_lea.hbm %s231_s23, 16  ;;  %p1614_p12 = scmp.lt.u32.totalorder %s231_s23, %s2337_s1 }
 0x106   : > { %p1610_p5 = scmp.ne.s32.totalorder %s231_s23, %s1609_s27  ;;  %p1615_p0 = scmp.lt.u32.totalorder %s1982_s14, %s1609_s27 }
 0x107   : > { %p1617_p3 = scmp.lt.u32.totalorder %s1609_s27, %s231_s23 }
 0x108   : > { %p1611_p10 = pnand %p1610_p5, %p1353_p8  ;;  %p1616_p1 = por %p1615_p0, %p1614_p12 }
 0x10a   : > { %p1612_p11 = pneg %p1611_p10  ;;  %p1618_p13 = por %p1617_p3, %p1616_p1 }
 0x10c   : > { %p1619_p4 = pnand %p1618_p13, %p1612_p11 }
 0x10e   : > { %1622 = shalt.err (!%p1619_p4)  }
 0x10f   : > { %s1623_s28 = scalar_lea.vmem %s242_s4, 16  ;;  %p1630_p9 = scmp.lt.s32.totalorder %s242_s4, %s1974_s22 }
 0x110   : > { %p1624_p6 = scmp.ne.s32.totalorder %s242_s4, %s1623_s28  ;;  %p1631_p5 = scmp.lt.s32.totalorder %s1991_s30, %s1623_s28 }
 0x112   : > { %p1625_p2 = pnand %p1624_p6, %p1353_p8  ;;  %p1632_p10 = por %p1631_p5, %p1630_p9 }
 0x114   : > { %p1626_p7 = pneg %p1625_p2 }
 0x116   : > { %p1633_p0 = pnand %p1632_p10, %p1626_p7 }
 0x118   : > { %1636 = shalt.err (!%p1633_p0)  }
 0x119   : > { %1333 = dma.hbm_to_vmem [thread:$0]  (%p1353_p8), %s231_s23, 16, %s242_s4, %s233_s25 }
 0x11a   : > { %v245_v5 = vld [vmem:[%s218_s15] sm:$0x1]  ;;  %s248_s6 = scalar_lea.vmem [#allocation3], %s2112_s26  ;;  %s249_s17 = scalar_lea.sflag [#allocation4], %s2112_s26 }
 0x11b   : > { %v246_v6 = vadd.f32 %v245_v5, %v216_v4 }
 0x11c   : > { %1791 = dma.done.wait %s249_s17, 16 }
 0x11d   : > { %1792 = vsyncadd %s249_s17, 4294967280  ;;  %s2139_s18 = sadd.s32 5, %s2003_s12  ;;  %s257_s19 = ssub.s32 1, %s2112_s26 }
 0x11e   : > { %p1354_p11 = scmp.lt.s32.totalorder %s2139_s18, 128  ;;  %s2144_s5 = sand.u32 1, %s2139_s18 }
 0x11f   : > { %s262_s13 = scalar_lea.vmem [#allocation3], %s257_s19  ;;  %s263_s23 = scalar_lea.sflag [#allocation4], %s257_s19 }
 0x120   : > { %s1335_s15 = scalar_select %p1354_p11, [#allocation6], [#allocation41] }
 0x121   : > { %s1336_s2 = scalar_select %p1354_p11, %s2139_s18, 0 }
 0x122   : > { %s271_s16 = sshll.u32 %s262_s13, 4  ;;  %s272_s16 = int_to_ptr.vmem [resolvable:$true] %s271_s16 }
 0x123   : > { %s259_s29 = sld [smem:[%s1335_s15 + %s1336_s2]] }
 0x129   : > { %s924_s4 = sshll.u32 %s259_s29, 4 }
 0x12a   : > { %s261_s21 = scalar_lea.hbm %s2337_s1, %s924_s4 }
 0x12b   : > { %s1637_s25 = scalar_lea.hbm %s261_s21, 16  ;;  %p1642_p3 = scmp.lt.u32.totalorder %s261_s21, %s2337_s1 }
 0x12c   : > { %p1638_p8 = scmp.ne.s32.totalorder %s261_s21, %s1637_s25  ;;  %p1643_p13 = scmp.lt.u32.totalorder %s1982_s14, %s1637_s25 }
 0x12d   : > { %p1645_p6 = scmp.lt.u32.totalorder %s1637_s25, %s261_s21 }
 0x12e   : > { %p1639_p12 = pnand %p1638_p8, %p1354_p11  ;;  %p1644_p4 = por %p1643_p13, %p1642_p3 }
 0x130   : > { %p1640_p1 = pneg %p1639_p12  ;;  %p1646_p2 = por %p1645_p6, %p1644_p4 }
 0x132   : > { %p1647_p7 = pnand %p1646_p2, %p1640_p1 }
 0x134   : > { %1650 = shalt.err (!%p1647_p7)  }
 0x135   : > { %s1651_s24 = scalar_lea.vmem %s272_s16, 16  ;;  %p1658_p0 = scmp.lt.s32.totalorder %s272_s16, %s1974_s22 }
 0x136   : > { %p1652_p9 = scmp.ne.s32.totalorder %s272_s16, %s1651_s24  ;;  %p1659_p8 = scmp.lt.s32.totalorder %s1991_s30, %s1651_s24 }
 0x138   : > { %p1653_p5 = pnand %p1652_p9, %p1354_p11  ;;  %p1660_p12 = por %p1659_p8, %p1658_p0 }
 0x13a   : > { %p1654_p10 = pneg %p1653_p5 }
 0x13c   : > { %p1661_p3 = pnand %p1660_p12, %p1654_p10 }
 0x13e   : > { %1664 = shalt.err (!%p1661_p3)  }
 0x13f   : > { %1337 = dma.hbm_to_vmem [thread:$0]  (%p1354_p11), %s261_s21, 16, %s272_s16, %s263_s23 }
 0x140   : > { %v275_v7 = vld [vmem:[%s248_s6] sm:$0x1]  ;;  %s278_s28 = scalar_lea.vmem [#allocation3], %s2144_s5  ;;  %s279_s17 = scalar_lea.sflag [#allocation4], %s2144_s5 }
 0x141   : > { %v276_v8 = vadd.f32 %v275_v7, %v246_v6 }
 0x142   : > { %1793 = dma.done.wait %s279_s17, 16 }
 0x143   : > { %1794 = vsyncadd %s279_s17, 4294967280  ;;  %s2171_s19 = sadd.s32 6, %s2003_s12  ;;  %s287_s18 = ssub.s32 1, %s2144_s5 }
 0x144   : > { %p1355_p1 = scmp.lt.s32.totalorder %s2171_s19, 128  ;;  %s2176_s26 = sand.u32 1, %s2171_s19 }
 0x145   : > { %s292_s29 = scalar_lea.vmem [#allocation3], %s287_s18  ;;  %s293_s21 = scalar_lea.sflag [#allocation4], %s287_s18 }
 0x146   : > { %s1339_s6 = scalar_select %p1355_p1, [#allocation6], [#allocation42] }
 0x147   : > { %s1340_s15 = scalar_select %p1355_p1, %s2171_s19, 0 }
 0x148   : > { %s301_s13 = sshll.u32 %s292_s29, 4  ;;  %s302_s13 = int_to_ptr.vmem [resolvable:$true] %s301_s13 }
 0x149   : > { %s289_s2 = sld [smem:[%s1339_s6 + %s1340_s15]] }
 0x14f   : > { %s926_s16 = sshll.u32 %s289_s2, 4 }
 0x150   : > { %s291_s20 = scalar_lea.hbm %s2337_s1, %s926_s16 }
 0x151   : > { %s1665_s23 = scalar_lea.hbm %s291_s20, 16  ;;  %p1670_p6 = scmp.lt.u32.totalorder %s291_s20, %s2337_s1 }
 0x152   : > { %p1666_p11 = scmp.ne.s32.totalorder %s291_s20, %s1665_s23  ;;  %p1671_p2 = scmp.lt.u32.totalorder %s1982_s14, %s1665_s23 }
 0x153   : > { %p1673_p9 = scmp.lt.u32.totalorder %s1665_s23, %s291_s20 }
 0x154   : > { %p1667_p13 = pnand %p1666_p11, %p1355_p1  ;;  %p1672_p7 = por %p1671_p2, %p1670_p6 }
 0x156   : > { %p1668_p4 = pneg %p1667_p13  ;;  %p1674_p5 = por %p1673_p9, %p1672_p7 }
 0x158   : > { %p1675_p10 = pnand %p1674_p5, %p1668_p4 }
 0x15a   : > { %1678 = shalt.err (!%p1675_p10)  }
 0x15b   : > { %s1679_s3 = scalar_lea.vmem %s302_s13, 16  ;;  %p1686_p3 = scmp.lt.s32.totalorder %s302_s13, %s1974_s22 }
 0x15c   : > { %p1680_p0 = scmp.ne.s32.totalorder %s302_s13, %s1679_s3  ;;  %p1687_p11 = scmp.lt.s32.totalorder %s1991_s30, %s1679_s3 }
 0x15e   : > { %p1681_p8 = pnand %p1680_p0, %p1355_p1  ;;  %p1688_p13 = por %p1687_p11, %p1686_p3 }
 0x160   : > { %p1682_p12 = pneg %p1681_p8 }
 0x162   : > { %p1689_p2 = pnand %p1688_p13, %p1682_p12 }
 0x164   : > { %1692 = shalt.err (!%p1689_p2)  }
 0x165   : > { %1341 = dma.hbm_to_vmem [thread:$0]  (%p1355_p1), %s291_s20, 16, %s302_s13, %s293_s21 }
 0x166   : > { %v305_v9 = vld [vmem:[%s278_s28] sm:$0x1]  ;;  %s308_s24 = scalar_lea.vmem [#allocation3], %s2176_s26  ;;  %s309_s17 = scalar_lea.sflag [#allocation4], %s2176_s26 }
 0x167   : > { %v306_v10 = vadd.f32 %v305_v9, %v276_v8 }
 0x168   : > { %1795 = dma.done.wait %s309_s17, 16 }
 0x169   : > { %1796 = vsyncadd %s309_s17, 4294967280  ;;  %s2203_s18 = sadd.s32 7, %s2003_s12  ;;  %s317_s19 = ssub.s32 1, %s2176_s26 }
 0x16a   : > { %p1356_p4 = scmp.lt.s32.totalorder %s2203_s18, 128  ;;  %s2208_s5 = sand.u32 1, %s2203_s18 }
 0x16b   : > { %s322_s2 = scalar_lea.vmem [#allocation3], %s317_s19  ;;  %s323_s20 = scalar_lea.sflag [#allocation4], %s317_s19 }
 0x16c   : > { %s1343_s28 = scalar_select %p1356_p4, [#allocation6], [#allocation43] }
 0x16d   : > { %s1344_s6 = scalar_select %p1356_p4, %s2203_s18, 0 }
 0x16e   : > { %s331_s29 = sshll.u32 %s322_s2, 4  ;;  %s332_s29 = int_to_ptr.vmem [resolvable:$true] %s331_s29 }
 0x16f   : > { %s319_s15 = sld [smem:[%s1343_s28 + %s1344_s6]] }
 0x175   : > { %s928_s13 = sshll.u32 %s319_s15, 4 }
 0x176   : > { %s321_s0 = scalar_lea.hbm %s2337_s1, %s928_s13 }
 0x177   : > { %s1693_s21 = scalar_lea.hbm %s321_s0, 16  ;;  %p1698_p9 = scmp.lt.u32.totalorder %s321_s0, %s2337_s1 }
 0x178   : > { %p1694_p1 = scmp.ne.s32.totalorder %s321_s0, %s1693_s21  ;;  %p1699_p5 = scmp.lt.u32.totalorder %s1982_s14, %s1693_s21 }
 0x179   : > { %p1701_p0 = scmp.lt.u32.totalorder %s1693_s21, %s321_s0 }
 0x17a   : > { %p1695_p6 = pnand %p1694_p1, %p1356_p4  ;;  %p1700_p10 = por %p1699_p5, %p1698_p9 }
 0x17c   : > { %p1696_p7 = pneg %p1695_p6  ;;  %p1702_p8 = por %p1701_p0, %p1700_p10 }
 0x17e   : > { %p1703_p12 = pnand %p1702_p8, %p1696_p7 }
 0x180   : > { %1706 = shalt.err (!%p1703_p12)  }
 0x181   : > { %s1707_s27 = scalar_lea.vmem %s332_s29, 16  ;;  %p1714_p2 = scmp.lt.s32.totalorder %s332_s29, %s1974_s22 }
 0x182   : > { %p1708_p3 = scmp.ne.s32.totalorder %s332_s29, %s1707_s27  ;;  %p1715_p1 = scmp.lt.s32.totalorder %s1991_s30, %s1707_s27 }
 0x184   : > { %p1709_p11 = pnand %p1708_p3, %p1356_p4  ;;  %p1716_p6 = por %p1715_p1, %p1714_p2 }
 0x186   : > { %p1710_p13 = pneg %p1709_p11 }
 0x188   : > { %p1717_p5 = pnand %p1716_p6, %p1710_p13 }
 0x18a   : > { %1720 = shalt.err (!%p1717_p5)  }
 0x18b   : > { %1345 = dma.hbm_to_vmem [thread:$0]  (%p1356_p4), %s321_s0, 16, %s332_s29, %s323_s20 }
 0x18c   : > { %v335_v11 = vld [vmem:[%s308_s24] sm:$0x1]  ;;  %s338_s3 = scalar_lea.vmem [#allocation3], %s2208_s5  ;;  %s339_s17 = scalar_lea.sflag [#allocation4], %s2208_s5 }
 0x18d   : > { %v336_v12 = vadd.f32 %v335_v11, %v306_v10 }
 0x18e   : > { %1797 = dma.done.wait %s339_s17, 16 }
 0x18f   : > { %1798 = vsyncadd %s339_s17, 4294967280  ;;  %s342_s19 = sadd.s32 8, %s2003_s12  ;;  %s347_s18 = ssub.s32 1, %s2208_s5 }
 0x190   : > { %p2235_p7 = scmp.lt.s32.totalorder %s342_s19, 128  ;;  %s352_s6 = scalar_lea.vmem [#allocation3], %s347_s18 }
 0x191   : > { %s361_s15 = sshll.u32 %s352_s6, 4  ;;  %s353_s16 = scalar_lea.sflag [#allocation4], %s347_s18  ;;  %s362_s15 = int_to_ptr.vmem [resolvable:$true] %s361_s15 }
 0x192   : > { %s1347_s26 = scalar_select %p2235_p7, [#allocation6], [#allocation44] }
 0x193   : > { %s2349_s19 = smov (!%p2235_p7, %s342_s19), 0 }
 0x194   : > { %s349_s24 = sld [smem:[%s1347_s26 + %s2349_s19]] }
 0x19a   : > { %s930_s2 = sshll.u32 %s349_s24, 4 }
 0x19b   : > { %s351_s13 = scalar_lea.hbm %s2337_s1, %s930_s2 }
 0x19c   : > { %s1721_s4 = scalar_lea.hbm %s351_s13, 16  ;;  %p1726_p0 = scmp.lt.u32.totalorder %s351_s13, %s2337_s1 }
 0x19d   : > { %p1722_p4 = scmp.ne.s32.totalorder %s351_s13, %s1721_s4  ;;  %p1727_p8 = scmp.lt.u32.totalorder %s1982_s14, %s1721_s4 }
 0x19e   : > { %p1729_p3 = scmp.lt.u32.totalorder %s1721_s4, %s351_s13 }
 0x19f   : > { %p1723_p9 = pnand %p1722_p4, %p2235_p7  ;;  %p1728_p12 = por %p1727_p8, %p1726_p0 }
 0x1a1   : > { %p1724_p10 = pneg %p1723_p9  ;;  %p1730_p11 = por %p1729_p3, %p1728_p12 }
 0x1a3   : > { %p1731_p13 = pnand %p1730_p11, %p1724_p10 }
 0x1a5   : > { %1734 = shalt.err (!%p1731_p13)  }
 0x1a6   : > { %s1735_s21 = scalar_lea.vmem %s362_s15, 16  ;;  %p1742_p5 = scmp.lt.s32.totalorder %s362_s15, %s1974_s22 }
 0x1a7   : > { %p1736_p2 = scmp.ne.s32.totalorder %s362_s15, %s1735_s21  ;;  %p1743_p4 = scmp.lt.s32.totalorder %s1991_s30, %s1735_s21 }
 0x1a9   : > { %p1737_p1 = pnand %p1736_p2, %p2235_p7  ;;  %p1744_p9 = por %p1743_p4, %p1742_p5 }
 0x1ab   : > { %p1738_p6 = pneg %p1737_p1 }
 0x1ad   : > { %p1745_p0 = pnand %p1744_p9, %p1738_p6 }
 0x1af   : > { %1748 = shalt.err (!%p1745_p0)  }
 0x1b0   : > { %1349 = dma.hbm_to_vmem [thread:$0]  (%p2235_p7), %s351_s13, 16, %s362_s15, %s353_s16 }
 0x1b1   : > { %v365_v13 = vld [vmem:[%s338_s3] sm:$0x1]  ;;  %s367_s23 = scalar_lea.vmem [#allocation2], %s1803_s11  ;;  %s124_s11 = sadd.s32 1, %s1803_s11  }
 0x1b2   : > { %v366_v14 = vadd.f32 %v365_v13, %v336_v12  ;;  %p121_p10 = scmp.ge.s32.totalorder %s124_s11, 16  }
 0x1b3   :  { %v387_v15 = vld [vmem:[#allocation10] sm:$0xff] (%p121_p10)  ;;  %v388_v16 = vld [vmem:[#allocation10 + $0x8] sm:$0xff] (%p121_p10)  ;;  %v389_v17 = vld [vmem:[#allocation10 + $0x10] sm:$0xff] (%p121_p10)  ;;  %v1814_v18 = vmov (%p121_p10), 0.0|0.0   ;;  %vm1815_vm0 = vmmov (%p121_p10), 0   ;;  %v1816_v21 = vmov (%p121_p10), 0.0  }
 0x1b4   : > { %368 = vst [vmem:[%s367_s23] sm:$0x1] %v366_v14  ;;  %123 = sbr.rel (!%p121_p10) target bundleno = 130 (0x82), region = 190  ;;  %1196 = vmatprep.subr.bf16.mxu0 (%p121_p10), %v1814_v18  ;;  %v1197_v19 = vpack.c.bf16 (%p121_p10), %v388_v16, %v387_v15  ;;  %v390_v20 = vld [vmem:[#allocation10 + $0x18] sm:$0xff] (%p121_p10)  ;;  %1053 = vmatprep.mubr.msk.f32.mxu0 (%p121_p10), %vm1815_vm0, %v1816_v21  ;;  %v391_v23 = vld [vmem:[#allocation10 + $0x20] sm:$0xff] (%p121_p10)  ;;  %v392_v24 = vld [vmem:[#allocation10 + $0x28] sm:$0xff] (%p121_p10)  ;;  %s1817_s5 = smov (%p121_p10), [#allocation16]  }
 0x1b5   :  { %1244 = vmatprep.subr.bf16.mxu1 (%p121_p10), %v1814_v18  ;;  %1123 = vmatprep.mubr.msk.f32.mxu1 (%p121_p10), %vm1815_vm0, %v1816_v21  ;;  %v1200_v22 = vpack.c.bf16 (%p121_p10), %v390_v20, %v389_v17  ;;  %v1203_v25 = vpack.c.bf16 (%p121_p10), %v392_v24, %v391_v23  ;;  %v393_v26 = vld [vmem:[#allocation10 + $0x30] sm:$0xff] (%p121_p10)  ;;  %v394_v27 = vld [vmem:[#allocation10 + $0x38] sm:$0xff] (%p121_p10)  ;;  %v395_v29 = vld [vmem:[#allocation10 + $0x40] sm:$0xff] (%p121_p10)  ;;  %s833_s25 = sshll.u32 (%p121_p10), %s1817_s5, 4  ;;  %s834_s25 = int_to_ptr.vmem [resolvable:$true] %s833_s25 }
 0x1b6   :  { %1198 = vmatpush3.bf16.msra.mxu0 (%p121_p10), %v1197_v19  ;;  %v1206_v28 = vpack.c.bf16 (%p121_p10), %v394_v27, %v393_v26  ;;  %v544_v30 = vld [vmem:[#allocation12] sm:$0xff] (%p121_p10)  ;;  %v545_v31 = vld [vmem:[#allocation12 + $0x8] sm:$0xff] (%p121_p10)  ;;  %v546_v34 = vld [vmem:[#allocation12 + $0x10] sm:$0xff] (%p121_p10)  ;;  %s1749_s27 = scalar_lea.vmem (%p121_p10), %s834_s25, 128  ;;  %p1754_p8 = scmp.lt.s32.totalorder (%p121_p10), %s834_s25, %s834_s25 }
 0x1b7   :  { %1199 = vmatprep.subr.bf16.mxu0 (%p121_p10), %v1814_v18  ;;  %v396_v32 = vld [vmem:[#allocation10 + $0x48] sm:$0xff] (%p121_p10)  ;;  %v1245_v33 = vpack.c.bf16 (%p121_p10), %v545_v31, %v544_v30  ;;  %v547_v35 = vld [vmem:[#allocation12 + $0x18] sm:$0xff] (%p121_p10)  ;;  %v548_v38 = vld [vmem:[#allocation12 + $0x20] sm:$0xff] (%p121_p10)  ;;  %p1750_p7 = scmp.ne.s32.totalorder (%p121_p10), %s834_s25, %s1749_s27  ;;  %p1755_p12 = scmp.lt.s32.totalorder (%p121_p10), %s1749_s27, %s1749_s27 }
 0x1b8   :  { %v1248_v36 = vpack.c.bf16 (%p121_p10), %v547_v35, %v546_v34  ;;  %v1209_v37 = vpack.c.bf16 (%p121_p10), %v396_v32, %v395_v29  ;;  %v549_v39 = vld [vmem:[#allocation12 + $0x28] sm:$0xff] (%p121_p10)  ;;  %v397_v40 = vld [vmem:[#allocation10 + $0x50] sm:$0xff] (%p121_p10)  ;;  %v398_v41 = vld [vmem:[#allocation10 + $0x58] sm:$0xff] (%p121_p10) }
 0x1b9   :  { %1246 = vmatpush3.bf16.msra.mxu1 (%p121_p10), %v1245_v33  ;;  %v1251_v42 = vpack.c.bf16 (%p121_p10), %v549_v39, %v548_v38  ;;  %v1212_v43 = vpack.c.bf16 (%p121_p10), %v398_v41, %v397_v40  ;;  %v550_v44 = vld [vmem:[#allocation12 + $0x30] sm:$0xff] (%p121_p10)  ;;  %v551_v45 = vld [vmem:[#allocation12 + $0x38] sm:$0xff] (%p121_p10)  ;;  %v399_v46 = vld [vmem:[#allocation10 + $0x60] sm:$0xff] (%p121_p10)  ;;  %p1756_p3 = por (%p121_p10), %p1755_p12, %p1754_p8 }
 0x1ba   :  { %1201 = vmatpush3.bf16.msra.mxu0 (%p121_p10), %v1200_v22  ;;  %1247 = vmatprep.subr.bf16.mxu1 (%p121_p10), %v1814_v18  ;;  %v400_v47 = vld [vmem:[#allocation10 + $0x68] sm:$0xff] (%p121_p10)  ;;  %v1254_v48 = vpack.c.bf16 (%p121_p10), %v551_v45, %v550_v44  ;;  %v552_v50 = vld [vmem:[#allocation12 + $0x40] sm:$0xff] (%p121_p10)  ;;  %v401_v52 = vld [vmem:[#allocation10 + $0x70] sm:$0xff] (%p121_p10) }
 0x1bb   :  { %1202 = vmatprep.subr.bf16.mxu0 %v1814_v18  ;;  %v1215_v49 = vpack.c.bf16 %v400_v47, %v399_v46  ;;  %v553_v51 = vld [vmem:[#allocation12 + $0x48] sm:$0xff]  ;;  %v402_v53 = vld [vmem:[#allocation10 + $0x78] sm:$0xff]  ;;  %v554_v56 = vld [vmem:[#allocation12 + $0x50] sm:$0xff]  ;;  %p1757_p11 = pnand %p1756_p3, %p1750_p7 }
 0x1bc   :  { %v1257_v54 = vpack.c.bf16 %v553_v51, %v552_v50  ;;  %v1218_v55 = vpack.c.bf16 %v402_v53, %v401_v52  ;;  %v555_v57 = vld [vmem:[#allocation12 + $0x58] sm:$0xff]  ;;  %v371_v58 = vld [vmem:[#allocation7] sm:$0xff]  ;;  %v372_v59 = vld [vmem:[#allocation7 + $0x8] sm:$0xff] }
 0x1bd   :  { %1249 = vmatpush3.bf16.msra.mxu1 %v1248_v36  ;;  %v1260_v60 = vpack.c.bf16 %v555_v57, %v554_v56  ;;  %v370_v61 = vld [vmem:[#allocation2 + $0x8] sm:$0xff]  ;;  %v1221_v62 = vpack.c.bf16 %v372_v59, %v371_v58  ;;  %v556_v63 = vld [vmem:[#allocation12 + $0x60] sm:$0xff]  ;;  %v557_v0 = vld [vmem:[#allocation12 + $0x68] sm:$0xff] }
 0x1be   :  { %1204 = vmatpush3.bf16.msra.mxu0 %v1203_v25  ;;  %1250 = vmatprep.subr.bf16.mxu1 %v1814_v18  ;;  %v373_v1 = vld [vmem:[#allocation7 + $0x10] sm:$0xff]  ;;  %v374_v2 = vld [vmem:[#allocation7 + $0x18] sm:$0xff]  ;;  %v1263_v3 = vpack.c.bf16 %v557_v0, %v556_v63  ;;  %v375_v5 = vld [vmem:[#allocation7 + $0x20] sm:$0xff] }
 0x1bf   :  { %1205 = vmatprep.subr.bf16.mxu0 %v1814_v18  ;;  %v1224_v4 = vpack.c.bf16 %v374_v2, %v373_v1  ;;  %v376_v6 = vld [vmem:[#allocation7 + $0x28] sm:$0xff]  ;;  %v377_v8 = vld [vmem:[#allocation7 + $0x30] sm:$0xff]  ;;  %v378_v9 = vld [vmem:[#allocation7 + $0x38] sm:$0xff] }
 0x1c0   :  { %v1227_v7 = vpack.c.bf16 %v376_v6, %v375_v5  ;;  %v1230_v10 = vpack.c.bf16 %v378_v9, %v377_v8  ;;  %v379_v11 = vld [vmem:[#allocation7 + $0x40] sm:$0xff]  ;;  %v380_v12 = vld [vmem:[#allocation7 + $0x48] sm:$0xff]  ;;  %v381_v14 = vld [vmem:[#allocation7 + $0x50] sm:$0xff] }
 0x1c1   :  { %1252 = vmatpush3.bf16.msra.mxu1 %v1251_v42  ;;  %v1233_v13 = vpack.c.bf16 %v380_v12, %v379_v11  ;;  %v382_v15 = vld [vmem:[#allocation7 + $0x58] sm:$0xff]  ;;  %v383_v17 = vld [vmem:[#allocation7 + $0x60] sm:$0xff]  ;;  %v384_v19 = vld [vmem:[#allocation7 + $0x68] sm:$0xff] }
 0x1c2   :  { %1207 = vmatpush3.bf16.msra.mxu0 %v1206_v28  ;;  %1253 = vmatprep.subr.bf16.mxu1 %v1814_v18  ;;  %v1236_v16 = vpack.c.bf16 %v382_v15, %v381_v14  ;;  %v1239_v20 = vpack.c.bf16 %v384_v19, %v383_v17  ;;  %v385_v22 = vld [vmem:[#allocation7 + $0x70] sm:$0xff]  ;;  %v386_v23 = vld [vmem:[#allocation7 + $0x78] sm:$0xff]  ;;  %v638_v29 = vld [vmem:[#allocation13] sm:$0xff] }
 0x1c3   :  { %1208 = vmatprep.subr.bf16.mxu0 %v1814_v18  ;;  %v1242_v24 = vpack.c.bf16 %v386_v23, %v385_v22  ;;  %v369_v25 = vld [vmem:[#allocation2] sm:$0xff]  ;;  %v559_v27 = vld [vmem:[#allocation12 + $0x78] sm:$0xff]  ;;  %v642_v38 = vld [vmem:[#allocation13 + $0x20] sm:$0xff] }
 0x1c4   :  { %v558_v26 = vld [vmem:[#allocation12 + $0x70] sm:$0xff]  ;;  %v639_v30 = vld [vmem:[#allocation13 + $0x8] sm:$0xff]  ;;  %v641_v36 = vld [vmem:[#allocation13 + $0x18] sm:$0xff] }
 0x1c5   :  { %1255 = vmatpush3.bf16.msra.mxu1 %v1254_v48  ;;  %v1266_v28 = vpack.c.bf16 %v559_v27, %v558_v26  ;;  %v1269_v32 = vpack.c.bf16 %v639_v30, %v638_v29  ;;  %v640_v35 = vld [vmem:[#allocation13 + $0x10] sm:$0xff]  ;;  %v643_v39 = vld [vmem:[#allocation13 + $0x28] sm:$0xff]  ;;  %v645_v42 = vld [vmem:[#allocation13 + $0x38] sm:$0xff] }
 0x1c6   :  { %1210 = vmatpush3.bf16.msra.mxu0 %v1209_v37  ;;  %1256 = vmatprep.subr.bf16.mxu1 %v1814_v18  ;;  %v1272_v37 = vpack.c.bf16 %v641_v36, %v640_v35  ;;  %v1275_v40 = vpack.c.bf16 %v643_v39, %v642_v38  ;;  %v644_v41 = vld [vmem:[#allocation13 + $0x30] sm:$0xff]  ;;  %v646_v44 = vld [vmem:[#allocation13 + $0x40] sm:$0xff]  ;;  %v647_v45 = vld [vmem:[#allocation13 + $0x48] sm:$0xff] }
 0x1c7   :  { %1211 = vmatprep.subr.bf16.mxu0 %v1814_v18  ;;  %v1281_v46 = vpack.c.bf16 %v647_v45, %v646_v44  ;;  %v649_v47 = vld [vmem:[#allocation13 + $0x58] sm:$0xff]  ;;  %v651_v50 = vld [vmem:[#allocation13 + $0x68] sm:$0xff]  ;;  %v652_v52 = vld [vmem:[#allocation13 + $0x70] sm:$0xff] }
 0x1c8   :  { %v653_v53 = vld [vmem:[#allocation13 + $0x78] sm:$0xff]  ;;  %v733_v56 = vld [vmem:[#allocation15 + $0x8] sm:$0xff]  ;;  %v734_v57 = vld [vmem:[#allocation15 + $0x10] sm:$0xff] }
 0x1c9   :  { %1258 = vmatpush3.bf16.msra.mxu1 %v1257_v54  ;;  %v1290_v54 = vpack.c.bf16 %v653_v53, %v652_v52  ;;  %v735_v59 = vld [vmem:[#allocation15 + $0x18] sm:$0xff]  ;;  %v738_v0 = vld [vmem:[#allocation15 + $0x30] sm:$0xff]  ;;  %v744_v9 = vld [vmem:[#allocation15 + $0x60] sm:$0xff] }
 0x1ca   :  { %1213 = vmatpush3.bf16.msra.mxu0 %v1212_v43  ;;  %1259 = vmatprep.subr.bf16.mxu1 %v1814_v18  ;;  %v1278_v43 = vpack.c.bf16 %v645_v42, %v644_v41  ;;  %v739_v1 = vld [vmem:[#allocation15 + $0x38] sm:$0xff]  ;;  %v742_v6 = vld [vmem:[#allocation15 + $0x50] sm:$0xff]  ;;  %v931_v12 = vld [vmem:[%s2343_s7] ss:$0 sm:$0xff] }
 0x1cb   :  { %1214 = vmatprep.subr.bf16.mxu0 %v1814_v18  ;;  %v1302_v2 = vpack.c.bf16 %v739_v1, %v738_v0  ;;  %v746_v17 = vld [vmem:[#allocation15 + $0x70] sm:$0xff]  ;;  %v747_v19 = vld [vmem:[#allocation15 + $0x78] sm:$0xff]  ;;  %v932_v22 = vld [vmem:[%s2344_s8] ss:$0 sm:$0xff] }
 0x1cc   :  { %v933_v26 = vld [vmem:[%s2345_s9] ss:$0 sm:$0xff] }
 0x1cd   :  { %1261 = vmatpush3.bf16.msra.mxu1 %v1260_v60  ;;  %v1296_v60 = vpack.c.bf16 %v735_v59, %v734_v57 }
 0x1ce   :  { %1216 = vmatpush3.bf16.msra.mxu0 %v1215_v49  ;;  %1262 = vmatprep.subr.bf16.mxu1 %v1814_v18  ;;  %v650_v49 = vld [vmem:[#allocation13 + $0x60] sm:$0xff] }
 0x1cf   :  { %1217 = vmatprep.subr.bf16.mxu0 %v1814_v18  ;;  %v1287_v51 = vpack.c.bf16 %v651_v50, %v650_v49 }
 0x1d1   :  { %1264 = vmatpush3.bf16.msra.mxu1 %v1263_v3  ;;  %v740_v3 = vld [vmem:[#allocation15 + $0x40] sm:$0xff] }
 0x1d2   :  { %1219 = vmatpush3.bf16.msra.mxu0 %v1218_v55  ;;  %1265 = vmatprep.subr.bf16.mxu1 %v1814_v18  ;;  %v732_v55 = vld [vmem:[#allocation15] sm:$0xff] }
 0x1d3   :  { %1220 = vmatprep.subr.bf16.mxu0 %v1814_v18  ;;  %v1293_v58 = vpack.c.bf16 %v733_v56, %v732_v55 }
 0x1d5   :  { %1054 = vmatmul.mubr.f32.vlgmr.msra.gmra.mrb[0].mxu0 %v370_v61  ;;  %1267 = vmatpush3.bf16.msra.mxu1 %v1266_v28  ;;  %v736_v61 = vld [vmem:[#allocation15 + $0x20] sm:$0xff] }
 0x1d6   :  { %1222 = vmatpush3.bf16.msra.mxu0 %v1221_v62  ;;  %1088 = vmatprep.mubr.msk.f32.mxu0 %vm1815_vm0, %v1816_v21  ;;  %v737_v62 = vld [vmem:[#allocation15 + $0x28] sm:$0xff] }
 0x1d7   :  { %1223 = vmatprep.subr.bf16.mxu0 %v1814_v18  ;;  %1268 = vmatprep.subr.bf16.mxu1 %v1814_v18  ;;  %v1299_v63 = vpack.c.bf16 %v737_v62, %v736_v61 }
 0x1da   :  { %1225 = vmatpush3.bf16.msra.mxu0 %v1224_v4  ;;  %v741_v4 = vld [vmem:[#allocation15 + $0x48] sm:$0xff] }
 0x1db   :  { %1226 = vmatprep.subr.bf16.mxu0 %v1814_v18  ;;  %v1305_v5 = vpack.c.bf16 %v741_v4, %v740_v3 }
 0x1de   :  { %1228 = vmatpush3.bf16.msra.mxu0 %v1227_v7  ;;  %v743_v7 = vld [vmem:[#allocation15 + $0x58] sm:$0xff] }
 0x1df   :  { %1229 = vmatprep.subr.bf16.mxu0 %v1814_v18  ;;  %v1308_v8 = vpack.c.bf16 %v743_v7, %v742_v6 }
 0x1e2   :  { %1231 = vmatpush3.bf16.msra.mxu0 %v1230_v10  ;;  %v745_v10 = vld [vmem:[#allocation15 + $0x68] sm:$0xff] }
 0x1e3   :  { %1232 = vmatprep.subr.bf16.mxu0 %v1814_v18  ;;  %v1311_v11 = vpack.c.bf16 %v745_v10, %v744_v9 }
 0x1e6   :  { %1234 = vmatpush3.bf16.msra.mxu0 %v1233_v13 }
 0x1e7   :  { %1235 = vmatprep.subr.bf16.mxu0 %v1814_v18 }
 0x1ea   :  { %1237 = vmatpush3.bf16.msra.mxu0 %v1236_v16 }
 0x1eb   :  { %1238 = vmatprep.subr.bf16.mxu0 %v1814_v18 }
 0x1ee   :  { %1240 = vmatpush3.bf16.msra.mxu0 %v1239_v20  ;;  %v1314_v20 = vpack.c.bf16 %v747_v19, %v746_v17 }
 0x1ef   :  { %1241 = vmatprep.subr.bf16.mxu0 %v1814_v18 }
 0x1f2   :  { %1243 = vmatpush3.bf16.msra.mxu0 %v1242_v24 }
 0x1f3   :  { %1292 = vmatprep.subr.bf16.mxu0 %v1814_v18 }
 0x1f5   :  { %1089 = vmatmul.mubr.f32.vlgmr.msra.gmra.mrb[0].mxu0 %v369_v25 }
 0x1f6   :  { %1193 = vmatprep.mubr.msk.f32.mxu0 %vm1815_vm0, %v1816_v21  ;;  %1294 = vmatpush3.bf16.msra.mxu0 %v1293_v58 }
 0x1f7   :  { %1295 = vmatprep.subr.bf16.mxu0 %v1814_v18 }
 0x1fa   :  { %1297 = vmatpush3.bf16.msra.mxu0 %v1296_v60 }
 0x1fb   :  { %1298 = vmatprep.subr.bf16.mxu0 %v1814_v18 }
 0x1fe   :  { %1300 = vmatpush3.bf16.msra.mxu0 %v1299_v63 }
 0x1ff   :  { %1301 = vmatprep.subr.bf16.mxu0 %v1814_v18 }
 0x202   :  { %1303 = vmatpush3.bf16.msra.mxu0 %v1302_v2 }
 0x203   :  { %1304 = vmatprep.subr.bf16.mxu0 %v1814_v18 }
 0x206   :  { %1306 = vmatpush3.bf16.msra.mxu0 %v1305_v5 }
 0x207   :  { %1307 = vmatprep.subr.bf16.mxu0 %v1814_v18 }
 0x20a   :  { %1309 = vmatpush3.bf16.msra.mxu0 %v1308_v8 }
 0x20b   :  { %1310 = vmatprep.subr.bf16.mxu0 %v1814_v18 }
 0x20e   :  { %1312 = vmatpush3.bf16.msra.mxu0 %v1311_v11 }
 0x20f   :  { %1313 = vmatprep.subr.bf16.mxu0 %v1814_v18 }
 0x212   :  { %1315 = vmatpush3.bf16.msra.mxu0 %v1314_v20 }
 0x2c8   :  { %v539_v31 = vpop.f32.mrb[0].mxu0 }
 0x2c9   :  { %v543_v33 = vmax.f32 %v539_v31, 0.0  ;;  %v1090_v34 = vpop.f32.mrb[1].mxu0 }
 0x2cb   :  { %1124 = vmatmul.mubr.f32.vlgmr.msra.gmra.mrb[0].mxu1 %v543_v33 }
 0x2cc   :  { %1270 = vmatpush3.bf16.msra.mxu1 %v1269_v32  ;;  %1158 = vmatprep.mubr.msk.f32.mxu1 %vm1815_vm0, %v1816_v21  ;;  %v648_v21 = vld [vmem:[#allocation13 + $0x50] sm:$0xff] }
 0x2cd   :  { %1271 = vmatprep.subr.bf16.mxu1 %v1814_v18  ;;  %v1284_v48 = vpack.c.bf16 %v649_v47, %v648_v21 }
 0x2d0   :  { %1273 = vmatpush3.bf16.msra.mxu1 %v1272_v37 }
 0x2d1   :  { %1274 = vmatprep.subr.bf16.mxu1 %v1814_v18 }
 0x2d4   :  { %1276 = vmatpush3.bf16.msra.mxu1 %v1275_v40 }
 0x2d5   :  { %1277 = vmatprep.subr.bf16.mxu1 %v1814_v18 }
 0x2d8   :  { %1279 = vmatpush3.bf16.msra.mxu1 %v1278_v43 }
 0x2d9   :  { %1280 = vmatprep.subr.bf16.mxu1 %v1814_v18 }
 0x2dc   :  { %1282 = vmatpush3.bf16.msra.mxu1 %v1281_v46 }
 0x2dd   :  { %1283 = vmatprep.subr.bf16.mxu1 %v1814_v18 }
 0x2e0   :  { %1285 = vmatpush3.bf16.msra.mxu1 %v1284_v48 }
 0x2e1   :  { %1286 = vmatprep.subr.bf16.mxu1 %v1814_v18 }
 0x2e4   :  { %1288 = vmatpush3.bf16.msra.mxu1 %v1287_v51 }
 0x2e5   :  { %1289 = vmatprep.subr.bf16.mxu1 %v1814_v18 }
 0x2e8   :  { %1291 = vmatpush3.bf16.msra.mxu1 %v1290_v54 }
 0x39e   :  { %v633_v13 = vpop.f32.mrb[0].mxu1 }
 0x39f   :  { %v634_v14 = vadd.f32 %v931_v12, %v633_v13  ;;  %v1125_v15 = vpop.f32.mrb[1].mxu1 }
 0x3a1   :  { %v637_v16 = vmax.f32 %v634_v14, 0.0 }
 0x3a3   :  { %1159 = vmatmul.mubr.f32.vlgmr.msra.gmra.mrb[2].mxu1 %v637_v16 }
 0x476   :  { %v727_v23 = vpop.f32.mrb[2].mxu1 }
 0x477   :  { %v728_v24 = vadd.f32 %v932_v22, %v727_v23  ;;  %v1160_v18 = vpop.f32.mrb[3].mxu1 }
 0x479   :  { %v731_v25 = vmax.f32 %v728_v24, 0.0 }
 0x47b   :  { %1194 = vmatmul.mubr.f32.vlgmr.msra.gmra.mrb[2].mxu0 %v731_v25 }
 0x54e   :  { %v821_v27 = vpop.f32.mrb[2].mxu0 }
 0x54f   :  { %v822_v28 = vadd.f32 %v933_v26, %v821_v27  ;;  %v1195_v29 = vpop.f32.mrb[3].mxu0 }
 0x551   :  { %1379 = vtanh.f32 %v822_v28 }
 0x55b   :  { %v1380_v30 = vpop.eup %1379 }
 0x55c   :  { %826 = vst [vmem:[#allocation16] sm:$0xff] %v1380_v30 }
 0x55d   :  { %1760 = shalt.err (!%p1757_p11)
}
 0x55e   :  { %s1761_s9 = scalar_lea.hbm %s2346_s10, 128 }
 0x55f   :  { %p1762_p13 = scmp.ne.s32.totalorder %s2346_s10, %s1761_s9  ;;  %p1765_p2 = scmp.lt.u32.totalorder %s1761_s9, %s2346_s10 }
 0x561   :  { %p1767_p1 = pnand %p1765_p2, %p1762_p13 }
 0x563   :  { %1770 = shalt.err (!%p1767_p1)
}
 0x564   :  { %836 = dma.vmem_to_hbm [thread:$0]  %s834_s25, 128, %s2346_s10, [#allocation9]  }
 0x565   :  { %1799 = dma.done.wait [#allocation9], 128  }
 0x566   :  { %1800 = vsyncadd [#allocation9], 4294967168 }
 0x567   :  { %840 = vsyncpa [#allocation8], 1 }
 0x568   :  { %841 = vsyncpa [#allocation11], 1 }
 0x569   :  { %842 = vsyncpa [#allocation14], 1 }
 0x56a   :  { %843 = vsyncpa [#allocation9], 1 }
 0x56b   :  { %844 = vsyncmov [#allocation4] }
 0x56e   :  { %s845_s6 = vpop.sfrf %844 }
 0x56f   :  { %p934_p6 = scmp.ne.s32.totalorder %s845_s6, 0 }
 0x571   :  { %849 = shalt.err (%p934_p6)  }
 0x572   :  { %851 = vsyncmov [#allocation4 + $0x1] }
 0x575   :  { %s852_s15 = vpop.sfrf %851 }
 0x576   :  { %p935_p5 = scmp.ne.s32.totalorder %s852_s15, 0 }
 0x578   :  { %856 = shalt.err (%p935_p5)  }

</bundles_post_ra>
